<compile_context>
chip_gen: v7x
topology: tpu7x:2x2x1
jax: 0.10.0
libtpu: 0.0.40
codegen_flags: <defaults>
</compile_context>

<pallas_src>
import functools

import numpy as np
import jax
import jax.numpy as jnp
from jax.experimental import pallas as pl
from jax.experimental.pallas import tpu as pltpu


def ortho_weight(ndim, rng):
    """Deterministic orthogonal (mem_dim x mem_dim) weight, mirrors the PyTorch init."""
    W = rng.standard_normal((ndim, ndim))
    u, _, _ = np.linalg.svd(W)
    return u.astype("float32")


def _round_up(n, m):
    return (n + m - 1) // m * m


# --------------------------------------------------------------------------- #
# Kernel
# --------------------------------------------------------------------------- #
def _cell_kernel(mem_dim, in_dim, matmul_dtype,
                 x_ref, lh_ref, rh_ref, lc_ref, rc_ref, w_ref, b_ref, ch_ref):
    M = mem_dim
    f32 = jnp.float32

    # Fused contraction K = in_dim + 2*mem_dim as three accumulating MXU passes
    # against sublane row-blocks of the resident packed weight.
    # Gate order along the fused output axis: [u, i, lf, rf, o].
    pre = jnp.dot(x_ref[...].astype(matmul_dtype), w_ref[:in_dim, :],
                  preferred_element_type=f32)
    pre = pre + jnp.dot(lh_ref[...].astype(matmul_dtype),
                        w_ref[in_dim:in_dim + M, :],
                        preferred_element_type=f32)
    pre = pre + jnp.dot(rh_ref[...].astype(matmul_dtype),
                        w_ref[in_dim + M:, :],
                        preferred_element_type=f32)
    pre = pre + b_ref[...]                       # (1, 5M) bias broadcast

    # One lane-dense tanh + ONE lane-dense sigmoid over the contiguous
    # [i, lf, rf, o] gate range (single EUP pass instead of four).
    u = jnp.tanh(pre[:, :M])                     # cx + ulh + urh
    sig = jax.nn.sigmoid(pre[:, M:])
    i = sig[:, 0 * M:1 * M]                      # ix + ilh + irh
    lf = sig[:, 1 * M:2 * M]                     # fx + lflh + lfrh
    rf = sig[:, 2 * M:3 * M]                     # fx + rflh + rfrh
    o = sig[:, 3 * M:4 * M]                      # ox + olh + orh

    # Cell math stays in f32 (v5e has no bf16 VPU/EUP).
    c = i * u + lf * lc_ref[...].astype(f32) + rf * rc_ref[...].astype(f32)
    h = o * jnp.tanh(c)

    # Direct slice stores into the fused [c | h] output (no lane-concat temp).
    ch_ref[:, :M] = c.astype(ch_ref.dtype)
    ch_ref[:, M:] = h.astype(ch_ref.dtype)


# --------------------------------------------------------------------------- #
# Wrapper
# --------------------------------------------------------------------------- #
def binary_tree_cell(x, lc, lh, rc, rh, w_fused, b_fused, *,
                     block_b=1024, matmul_dtype=jnp.bfloat16):
    """x:(B,in_dim); lc/lh/rc/rh:(B,mem_dim).
    w_fused:(in_dim+2*mem_dim, 5*mem_dim) packed as row-blocks [Wx; Wlh; Wrh]
    with gate order [u,i,lf,rf,o] along the output axis; b_fused:(1,5*mem_dim).
    Returns (c, h), each (B, mem_dim), float32."""
    B, in_dim = x.shape
    mem_dim = lh.shape[1]
    G = 5 * mem_dim
    K = in_dim + 2 * mem_dim
    assert w_fused.shape == (K, G), (w_fused.shape, (K, G))
    assert b_fused.shape == (1, G), (b_fused.shape, (1, G))
    assert block_b % 8 == 0

    # Row tile: as large as block_b allows, but keep >= 2 grid steps so the v7x
    # megacore can shard the "parallel" axis across both TensorCores.
    bb = min(block_b, _round_up(B, 8))
    if _round_up(B, bb) // bb < 2 and B >= 16:
        bb = _round_up((B + 1) // 2, 8)
    B_pad = _round_up(B, bb)

    if B_pad != B:
        # TODO(synk): for B >> bb, prefer a bb that divides B (or in-kernel tail
        # masking) over this pad, which costs an extra HBM pass over the inputs.
        pad_rows = lambda t: jnp.pad(t, ((0, B_pad - B), (0, 0)))
        x, lh, rh, lc, rc = map(pad_rows, (x, lh, rh, lc, rc))

    # Weights/bias are tiny and resident: pre-cast once outside the kernel.
    w = w_fused.astype(matmul_dtype)
    b = b_fused.astype(jnp.float32)

    grid = (B_pad // bb,)
    row_spec = lambda width: pl.BlockSpec((bb, width), lambda i: (i, 0))
    const_spec = lambda shape: pl.BlockSpec(shape, lambda i: (0, 0))

    # Explicit VMEM budget (double-buffered row tiles + resident weights) with
    # headroom; clamp so it stays safe on v7x's 64 MiB physical VMEM.
    tile_bytes = bb * (in_dim + 4 * mem_dim) * 4 + bb * 2 * mem_dim * 4
    w_bytes = K * G * jnp.dtype(matmul_dtype).itemsize + G * 4
    vmem_limit = int(min(max(4 * (tile_bytes + w_bytes), 32 << 20), 48 << 20))

    kernel = functools.partial(_cell_kernel, mem_dim, in_dim, matmul_dtype)
    ch = pl.pallas_call(
        kernel,
        out_shape=jax.ShapeDtypeStruct((B_pad, 2 * mem_dim), jnp.float32),
        grid=grid,
        in_specs=[
            row_spec(in_dim),       # x
            row_spec(mem_dim),      # lh
            row_spec(mem_dim),      # rh
            row_spec(mem_dim),      # lc
            row_spec(mem_dim),      # rc
            const_spec((K, G)),     # fused packed weights (resident)
            const_spec((1, G)),     # fused bias (resident)
        ],
        out_specs=row_spec(2 * mem_dim),   # fused [c | h]
        compiler_params=pltpu.CompilerParams(
            dimension_semantics=("parallel",),
            vmem_limit_bytes=vmem_limit),
    )(x, lh, rh, lc, rc, w, b)

    c = ch[:B, :mem_dim]
    h = ch[:B, mem_dim:]
    return c, h


# --------------------------------------------------------------------------- #
# Host-side weight packing (gate order: u, i, lf, rf, o)
# --------------------------------------------------------------------------- #
def pack_fused_params(params):
    # x-side rows: [cx, ix, fx, fx, ox]  (fx is shared by both forget gates)
    wx = jnp.concatenate(
        [params["cx_w"].T, params["ix_w"].T, params["fx_w"].T,
         params["fx_w"].T, params["ox_w"].T], axis=1)
    # lh-side rows: [ulh, ilh, lflh, rflh, olh]
    wlh = jnp.concatenate(
        [params["ulh"].T, params["ilh"].T, params["lflh"].T,
         params["rflh"].T, params["olh"].T], axis=1)
    # rh-side rows: [urh, irh, lfrh, rfrh, orh]
    wrh = jnp.concatenate(
        [params["urh"].T, params["irh"].T, params["lfrh"].T,
         params["rfrh"].T, params["orh"].T], axis=1)
    w_fused = jnp.concatenate([wx, wlh, wrh], axis=0)          # (K, 5*mem_dim)
    b_fused = jnp.concatenate(
        [params["cx_b"], params["ix_b"], params["fx_b"],
         params["fx_b"], params["ox_b"]], axis=0)[None, :]     # (1, 5*mem_dim)
    return w_fused, b_fused


# --------------------------------------------------------------------------- #
# References
# --------------------------------------------------------------------------- #
def _reference_module(x, lc, lh, rc, rh, params):
    """Pure-JAX reference mirroring the PyTorch forward exactly (f32)."""
    lin = lambda a, w, b=None: a @ w.T + (0.0 if b is None else b)
    u = jnp.tanh(lin(x, params["cx_w"], params["cx_b"])
                 + lin(lh, params["ulh"]) + lin(rh, params["urh"]))
    i = jax.nn.sigmoid(lin(x, params["ix_w"], params["ix_b"])
                       + lin(lh, params["ilh"]) + lin(rh, params["irh"]))
    lf = jax.nn.sigmoid(lin(x, params["fx_w"], params["fx_b"])
                        + lin(lh, params["lflh"]) + lin(rh, params["lfrh"]))
    rf = jax.nn.sigmoid(lin(x, params["fx_w"], params["fx_b"])
                        + lin(lh, params["rflh"]) + lin(rh, params["rfrh"]))
    c = i * u + lf * lc + rf * rc
    o = jax.nn.sigmoid(lin(x, params["ox_w"], params["ox_b"])
                       + lin(lh, params["olh"]) + lin(rh, params["orh"]))
    h = o * jnp.tanh(c)
    return c, h


def _reference_fused(x, lc, lh, rc, rh, w_fused, b_fused, mem_dim, in_dim, dt):
    """Pure-JAX reference with the SAME packing / cast / dot structure as the kernel."""
    M = mem_dim
    w = w_fused.astype(dt)
    pre = (jnp.dot(x.astype(dt), w[:in_dim], preferred_element_type=jnp.float32)
           + jnp.dot(lh.astype(dt), w[in_dim:in_dim + M],
                     preferred_element_type=jnp.float32)
           + jnp.dot(rh.astype(dt), w[in_dim + M:],
                     preferred_element_type=jnp.float32)
           + b_fused)
    u = jnp.tanh(pre[:, :M])
    sig = jax.nn.sigmoid(pre[:, M:])
    i, lf, rf, o = (sig[:, 0 * M:1 * M], sig[:, 1 * M:2 * M],
                    sig[:, 2 * M:3 * M], sig[:, 3 * M:4 * M])
    c = i * u + lf * lc + rf * rc
    h = o * jnp.tanh(c)
    return c, h


if __name__ == "__main__":
    # Many independent tree nodes (same level / many trees) batched per call.
    B = 256
    in_dim = 32
    mem_dim = 32   # must equal in_dim (see note at top)

    rng = np.random.default_rng(0)

    # --- deterministic parameter init (shapes from the module __init__) ---
    gate_names = ["ilh", "irh", "lflh", "lfrh", "rflh", "rfrh",
                  "ulh", "urh", "olh", "orh"]
    params = {n: jnp.asarray(ortho_weight(mem_dim, rng)) for n in gate_names}
    bound = 1.0 / np.sqrt(in_dim)
    for n in ["cx", "ox", "fx", "ix"]:
        params[n + "_w"] = jnp.asarray(ortho_weight(mem_dim, rng))
        params[n + "_b"] = jnp.asarray(
            rng.uniform(-bound, bound, size=(mem_dim,)).astype("float32"))

    w_fused, b_fused = pack_fused_params(params)

    # --- deterministic example inputs ---
    key = jax.random.PRNGKey(0)
    kx, klc, klh, krc, krh = jax.random.split(key, 5)
    x = jax.random.normal(kx, (B, in_dim), dtype=jnp.float32)
    lc = jax.random.normal(klc, (B, mem_dim), dtype=jnp.float32)
    lh = jax.random.normal(klh, (B, mem_dim), dtype=jnp.float32)
    rc = jax.random.normal(krc, (B, mem_dim), dtype=jnp.float32)
    rh = jax.random.normal(krh, (B, mem_dim), dtype=jnp.float32)

    # --- perf path: bf16 matmul operands, f32 accumulation & gate math ---
    c_bf, h_bf = binary_tree_cell(x, lc, lh, rc, rh, w_fused, b_fused,
                                  matmul_dtype=jnp.bfloat16)
    jax.block_until_ready((c_bf, h_bf))

    # --- exact path: f32 matmul operands (semantics check vs. PyTorch math) ---
    c_f32, h_f32 = binary_tree_cell(x, lc, lh, rc, rh, w_fused, b_fused,
                                    matmul_dtype=jnp.float32)
    jax.block_until_ready((c_f32, h_f32))

    # 1) f32 kernel vs. PyTorch-faithful unfused reference (tight tolerance)
    c_ref, h_ref = _reference_module(x, lc, lh, rc, rh, params)
    np.testing.assert_allclose(np.asarray(c_f32), np.asarray(c_ref), rtol=1e-5, atol=1e-5)
    np.testing.assert_allclose(np.asarray(h_f32), np.asarray(h_ref), rtol=1e-5, atol=1e-5)

    # 2) bf16 kernel vs. pure-JAX reference using the same bf16 cast / fused dots
    cb_ref, hb_ref = _reference_fused(x, lc, lh, rc, rh, w_fused, b_fused,
                                      mem_dim, in_dim, jnp.bfloat16)
    np.testing.assert_allclose(np.asarray(c_bf), np.asarray(cb_ref), rtol=2e-2, atol=2e-2)
    np.testing.assert_allclose(np.asarray(h_bf), np.asarray(hb_ref), rtol=2e-2, atol=2e-2)

    print("KERNEL_OK")
</pallas_src>

<mosaic_0001>
module attributes {stable_mosaic.version = 11 : i64} {
  func.func @_cell_kernel(%arg0: i32, %arg1: memref<128x32xf32, #tpu.memory_space<vmem>>, %arg2: memref<128x32xf32, #tpu.memory_space<vmem>>, %arg3: memref<128x32xf32, #tpu.memory_space<vmem>>, %arg4: memref<128x32xf32, #tpu.memory_space<vmem>>, %arg5: memref<128x32xf32, #tpu.memory_space<vmem>>, %arg6: memref<96x160xbf16, #tpu.memory_space<vmem>>, %arg7: memref<1x160xf32, #tpu.memory_space<vmem>>, %arg8: memref<128x64xf32, #tpu.memory_space<vmem>>) attributes {dimension_semantics = [#tpu.dimension_semantics<parallel>], iteration_bounds = array<i64: 2>, scalar_prefetch = 0 : i64, scratch_operands = 0 : i64, tpu.core_type = #tpu.core_type<tc>, window_params = [{transform_indices = @transform_0, window_bounds = array<i64: 128, 32>}, {transform_indices = @transform_1, window_bounds = array<i64: 128, 32>}, {transform_indices = @transform_2, window_bounds = array<i64: 128, 32>}, {transform_indices = @transform_3, window_bounds = array<i64: 128, 32>}, {transform_indices = @transform_4, window_bounds = array<i64: 128, 32>}, {pipeline_mode = #tpu.pipeline_mode<synchronous>, transform_indices = @transform_5, window_bounds = array<i64: 96, 160>}, {pipeline_mode = #tpu.pipeline_mode<synchronous>, transform_indices = @transform_6, window_bounds = array<i64: 1, 160>}, {transform_indices = @transform_7, window_bounds = array<i64: 128, 64>}]} {
    %c0 = arith.constant 0 : index
    %c0_0 = arith.constant 0 : index
    %0 = vector.load %arg1[%c0, %c0_0] : memref<128x32xf32, #tpu.memory_space<vmem>>, vector<128x32xf32>
    %1 = arith.truncf %0 : vector<128x32xf32> to vector<128x32xbf16>
    %c0_1 = arith.constant 0 : index
    %c0_2 = arith.constant 0 : index
    %2 = vector.load %arg6[%c0_1, %c0_2] : memref<96x160xbf16, #tpu.memory_space<vmem>>, vector<32x160xbf16>
    %cst = arith.constant dense<0.000000e+00> : vector<128x160xf32>
    %3 = tpu.matmul %1, %2, %cst {dimension_numbers = #tpu.dot_dimension_numbers<[1], [0], [0], [1], [0, 0, 1, 1], [], []>} : vector<128x32xbf16>, vector<32x160xbf16>, vector<128x160xf32> -> vector<128x160xf32>
    %c0_3 = arith.constant 0 : index
    %c0_4 = arith.constant 0 : index
    %4 = vector.load %arg2[%c0_3, %c0_4] : memref<128x32xf32, #tpu.memory_space<vmem>>, vector<128x32xf32>
    %5 = arith.truncf %4 : vector<128x32xf32> to vector<128x32xbf16>
    %c32 = arith.constant 32 : index
    %c0_5 = arith.constant 0 : index
    %6 = vector.load %arg6[%c32, %c0_5] : memref<96x160xbf16, #tpu.memory_space<vmem>>, vector<32x160xbf16>
    %cst_6 = arith.constant dense<0.000000e+00> : vector<128x160xf32>
    %7 = tpu.matmul %5, %6, %cst_6 {dimension_numbers = #tpu.dot_dimension_numbers<[1], [0], [0], [1], [0, 0, 1, 1], [], []>} : vector<128x32xbf16>, vector<32x160xbf16>, vector<128x160xf32> -> vector<128x160xf32>
    %8 = arith.addf %3, %7 : vector<128x160xf32>
    %c0_7 = arith.constant 0 : index
    %c0_8 = arith.constant 0 : index
    %9 = vector.load %arg3[%c0_7, %c0_8] : memref<128x32xf32, #tpu.memory_space<vmem>>, vector<128x32xf32>
    %10 = arith.truncf %9 : vector<128x32xf32> to vector<128x32xbf16>
    %c64 = arith.constant 64 : index
    %c0_9 = arith.constant 0 : index
    %11 = vector.load %arg6[%c64, %c0_9] : memref<96x160xbf16, #tpu.memory_space<vmem>>, vector<32x160xbf16>
    %cst_10 = arith.constant dense<0.000000e+00> : vector<128x160xf32>
    %12 = tpu.matmul %10, %11, %cst_10 {dimension_numbers = #tpu.dot_dimension_numbers<[1], [0], [0], [1], [0, 0, 1, 1], [], []>} : vector<128x32xbf16>, vector<32x160xbf16>, vector<128x160xf32> -> vector<128x160xf32>
    %13 = arith.addf %8, %12 : vector<128x160xf32>
    %c0_11 = arith.constant 0 : index
    %c0_12 = arith.constant 0 : index
    %14 = vector.load %arg7[%c0_11, %c0_12] : memref<1x160xf32, #tpu.memory_space<vmem>>, vector<1x160xf32>
    %15 = vector.broadcast %14 : vector<1x160xf32> to vector<128x160xf32>
    %16 = arith.addf %13, %15 : vector<128x160xf32>
    %17 = vector.extract_strided_slice %16 {offsets = [0, 0], sizes = [128, 32], strides = [1, 1]} : vector<128x160xf32> to vector<128x32xf32>
    %18 = math.tanh %17 : vector<128x32xf32>
    %19 = vector.extract_strided_slice %16 {offsets = [0, 32], sizes = [128, 128], strides = [1, 1]} : vector<128x160xf32> to vector<128x128xf32>
    %20 = arith.negf %19 : vector<128x128xf32>
    %21 = math.exp %20 : vector<128x128xf32>
    %cst_13 = arith.constant 1.000000e+00 : f32
    %22 = vector.broadcast %cst_13 : f32 to vector<128x128xf32>
    %23 = arith.addf %22, %21 : vector<128x128xf32>
    %24 = arith.divf %22, %23 : vector<128x128xf32>
    %25 = vector.extract_strided_slice %24 {offsets = [0, 0], sizes = [128, 32], strides = [1, 1]} : vector<128x128xf32> to vector<128x32xf32>
    %26 = vector.extract_strided_slice %24 {offsets = [0, 32], sizes = [128, 32], strides = [1, 1]} : vector<128x128xf32> to vector<128x32xf32>
    %27 = vector.extract_strided_slice %24 {offsets = [0, 64], sizes = [128, 32], strides = [1, 1]} : vector<128x128xf32> to vector<128x32xf32>
    %28 = vector.extract_strided_slice %24 {offsets = [0, 96], sizes = [128, 32], strides = [1, 1]} : vector<128x128xf32> to vector<128x32xf32>
    %29 = arith.mulf %25, %18 : vector<128x32xf32>
    %c0_14 = arith.constant 0 : index
    %c0_15 = arith.constant 0 : index
    %30 = vector.load %arg4[%c0_14, %c0_15] : memref<128x32xf32, #tpu.memory_space<vmem>>, vector<128x32xf32>
    %31 = arith.mulf %26, %30 : vector<128x32xf32>
    %32 = arith.addf %29, %31 : vector<128x32xf32>
    %c0_16 = arith.constant 0 : index
    %c0_17 = arith.constant 0 : index
    %33 = vector.load %arg5[%c0_16, %c0_17] : memref<128x32xf32, #tpu.memory_space<vmem>>, vector<128x32xf32>
    %34 = arith.mulf %27, %33 : vector<128x32xf32>
    %35 = arith.addf %32, %34 : vector<128x32xf32>
    %36 = math.tanh %35 : vector<128x32xf32>
    %37 = arith.mulf %28, %36 : vector<128x32xf32>
    %c0_18 = arith.constant 0 : index
    %c0_19 = arith.constant 0 : index
    %38 = vector.load %arg8[%c0_18, %c0_19] : memref<128x64xf32, #tpu.memory_space<vmem>>, vector<128x32xf32>
    tpu.vector_store %arg8[%c0_18, %c0_19], %35 {strides = array<i32>} : memref<128x64xf32, #tpu.memory_space<vmem>>, vector<128x32xf32>,
    %c0_20 = arith.constant 0 : index
    %c32_21 = arith.constant 32 : index
    %39 = vector.load %arg8[%c0_20, %c32_21] : memref<128x64xf32, #tpu.memory_space<vmem>>, vector<128x32xf32>
    tpu.vector_store %arg8[%c0_20, %c32_21], %37 {strides = array<i32>} : memref<128x64xf32, #tpu.memory_space<vmem>>, vector<128x32xf32>,
    return
  }
  func.func @transform_0(%arg0: i32) -> (i32, i32) {
    %c0_i32 = arith.constant 0 : i32
    %c0_i32_0 = arith.constant 0 : i32
    return %arg0, %c0_i32 : i32, i32
  }
  func.func @transform_1(%arg0: i32) -> (i32, i32) {
    %c0_i32 = arith.constant 0 : i32
    %c0_i32_0 = arith.constant 0 : i32
    return %arg0, %c0_i32 : i32, i32
  }
  func.func @transform_2(%arg0: i32) -> (i32, i32) {
    %c0_i32 = arith.constant 0 : i32
    %c0_i32_0 = arith.constant 0 : i32
    return %arg0, %c0_i32 : i32, i32
  }
  func.func @transform_3(%arg0: i32) -> (i32, i32) {
    %c0_i32 = arith.constant 0 : i32
    %c0_i32_0 = arith.constant 0 : i32
    return %arg0, %c0_i32 : i32, i32
  }
  func.func @transform_4(%arg0: i32) -> (i32, i32) {
    %c0_i32 = arith.constant 0 : i32
    %c0_i32_0 = arith.constant 0 : i32
    return %arg0, %c0_i32 : i32, i32
  }
  func.func @transform_5(%arg0: i32) -> (i32, i32) {
    %c0_i32 = arith.constant 0 : i32
    %c0_i32_0 = arith.constant 0 : i32
    %c0_i32_1 = arith.constant 0 : i32
    return %c0_i32, %c0_i32_0 : i32, i32
  }
  func.func @transform_6(%arg0: i32) -> (i32, i32) {
    %c0_i32 = arith.constant 0 : i32
    %c0_i32_0 = arith.constant 0 : i32
    %c0_i32_1 = arith.constant 0 : i32
    return %c0_i32, %c0_i32_0 : i32, i32
  }
  func.func @transform_7(%arg0: i32) -> (i32, i32) {
    %c0_i32 = arith.constant 0 : i32
    %c0_i32_0 = arith.constant 0 : i32
    return %arg0, %c0_i32 : i32, i32
  }
}

</mosaic_0001>

<bundles_post_ra>
// kernel: tpu_custom_call.1
= control target key start
LH: loop header
LB: loop body
LE: loop exit
PB: predicated region body
PF: predicated region fallthrough
CT: control target
= control target key end

     0   :  { %s2433_s24 = smov 0   ;;  %s3118_s0 = inlined_call_operand.vmem [shape: f32[256,32], index: 0, kind: input, shape index: {}]   ;;  %s3119_s1 = inlined_call_operand.vmem [shape: f32[256,32], index: 1, kind: input, shape index: {}]   ;;  %s3120_s2 = inlined_call_operand.vmem [shape: f32[256,32], index: 2, kind: input, shape index: {}]   ;;  %s3121_s3 = inlined_call_operand.vmem [shape: f32[256,32], index: 3, kind: input, shape index: {}]   ;;  %s3122_s4 = inlined_call_operand.vmem [shape: f32[256,32], index: 4, kind: input, shape index: {}]   ;;  %s3123_s5 = inlined_call_operand.vmem [shape: bf16[96,160], index: 5, kind: input, shape index: {}]   ;;  %s3124_s6 = inlined_call_operand.vmem [shape: f32[1,160], index: 6, kind: input, shape index: {}]   ;;  %s3125_s7 = inlined_call_operand.vmem [shape: f32[256,64], index: 7, kind: output, shape index: {}]  }
   0x1 LB: > { %s2004_s25 = sadd.s32 4294967295, %s2387_s24   ;;  %p2008_p0 = scmp.ge.s32.totalorder %s2387_s24, 1  ;;  %s2387_s24 = sphi %s2433_s24, %s17_s24  }
   0x2   : > { %p282_p1 = scmp.lt.s32.totalorder %s2387_s24, 3 }
   0x4   : > { %p283_p2 = pnand %p2008_p0, %p282_p1 }
   0x5   : > { %v2171_v0 = vld [vmem:[%s3123_s5 + $0x24] ss:$8 sps:$4 sm:$0xff] (!%p283_p2)   ;;  %s2009_s28 = sshll.u32 (!%p283_p2), %s2004_s25, 4  ;;  %v2389_v2 = vmov (!%p283_p2), 0   ;;  %v2175_v3 = vld [vmem:[%s3123_s5 + $0x20] ss:$8 sps:$4 sm:$0xff] (!%p283_p2)  }
   0x6   : > { %286 = sbr.rel (%p283_p2) target bundleno = 745 (0x2e9), region = 48  ;;  %v2173_v1 = vld [vmem:[%s3123_s5 + $0x4] ss:$8 sps:$4 sm:$0xff] (!%p283_p2)   ;;  %504 = vmatprep.mubr.bf16.mxu1 (!%p283_p2), %v2389_v2  ;;  %661 = vmatprep.mubr.bf16.mxu0 (!%p283_p2), %v2389_v2  ;;  %p335_p3 = scmp.lt.s32.totalorder (!%p283_p2), %s2009_s28, 31  ;;  %v2176_v4 = vld [vmem:[%s3123_s5] ss:$8 sps:$4 sm:$0xff] (!%p283_p2)  }
   0x7   : > { %472 = vmatprep.subr.bf16.mxu1 (!%p283_p2), %v2171_v0  ;;  %629 = vmatprep.subr.bf16.mxu0 (!%p283_p2), %v2173_v1  ;;  %v2177_v5 = vld [vmem:[%s3123_s5 + $0x34] ss:$8 sps:$4 sm:$0xff] (!%p283_p2)   ;;  %v2181_v7 = vld [vmem:[%s3123_s5 + $0x30] ss:$8 sps:$4 sm:$0xff] (!%p283_p2)   ;;  %v2185_v9 = vld [vmem:[%s3123_s5 + $0x44] ss:$8 sps:$4 sm:$0xff] (!%p283_p2)  }
   0x8   : > { %473 = vmatpush1.bf16.msra.mxu1 (!%p283_p2), %v2175_v3  ;;  %630 = vmatpush1.bf16.msra.mxu0 (!%p283_p2), %v2176_v4  ;;  %v2179_v6 = vld [vmem:[%s3123_s5 + $0x14] ss:$8 sps:$4 sm:$0xff] (!%p283_p2)   ;;  %v2182_v8 = vld [vmem:[%s3123_s5 + $0x10] ss:$8 sps:$4 sm:$0xff] (!%p283_p2)   ;;  %vm447_vm0 = vcmask (!%p283_p2), 261120   ;;  %s2390_s16 = smov (!%p283_p2), 64  }
   0x9   : > { %474 = vmatprep.subr.bf16.mxu1 (!%p283_p2), %v2177_v5  ;;  %631 = vmatprep.subr.bf16.mxu0 (!%p283_p2), %v2179_v6  ;;  %v2183_v15 = vld [vmem:[%s3123_s5 + $0x40] ss:$8 sps:$4 sm:$0xff] (!%p283_p2)   ;;  %v2188_v19 = vld [vmem:[%s3123_s5 + $0x54] ss:$8 sps:$4 sm:$0xff] (!%p283_p2)   ;;  %v2186_v22 = vld [vmem:[%s3123_s5 + $0x50] ss:$8 sps:$4 sm:$0xff] (!%p283_p2)  }
   0xa   : > { %s2391_s26 = smov (!%p283_p2), 96   ;;  %vm1883_vm1 = vcmask (!%p283_p2), 523520  }
   0xc   : > { %475 = vmatpush1.bf16.msra.mxu1 (!%p283_p2), %v2181_v7  ;;  %632 = vmatpush1.bf16.msra.mxu0 (!%p283_p2), %v2182_v8 }
   0xd   : > { %s3127_s28 = smov (!%p335_p3, %s2009_s28), 31  ;;  %814 = vmatprep.subr.bf16.mxu0 %v2185_v9  ;;  %2091 = vmatprep.subr.bf16.mxu1 %v2173_v1 }
   0xe   : > { %s2467_s20 = sshll.u32 %s3127_s28, 3  ;;  %s2392_s28 = smov 32  }
   0xf   : > { %s2473_s23 = scalar_lea.vmem %s3119_s1, %s2467_s20  ;;  %s2484_s29 = scalar_lea.vmem %s3118_s0, %s2467_s20 }
  0x10   : > { %v399_v10 = vld [vmem:[%s2473_s23] sm:$0xff]  ;;  %v400_v11 = vld [vmem:[%s2473_s23 + $0x8] sm:$0xff]  ;;  %v401_v17 = vld [vmem:[%s2473_s23 + $0x10] sm:$0xff]  ;;  %s2517_s15 = scalar_lea.vmem %s3121_s3, %s2467_s20  ;;  %s2541_s19 = scalar_lea.vmem %s3120_s2, %s2467_s20 }
  0x11   : > { %v415_v12 = vpack.c.bf16 %v400_v11, %v399_v10  ;;  %v371_v13 = vld [vmem:[%s2484_s29] sm:$0xff]  ;;  %v372_v14 = vld [vmem:[%s2484_s29 + $0x8] sm:$0xff]  ;;  %v402_v18 = vld [vmem:[%s2473_s23 + $0x18] sm:$0xff]  ;;  %s2586_s25 = scalar_lea.vmem %s3122_s4, %s2467_s20  ;;  %s3017_s8 = scalar_lea.vmem %s3125_s7, %s2467_s20 }
  0x12   : > { %v387_v16 = vpack.c.bf16 %v372_v14, %v371_v13  ;;  %v373_v20 = vld [vmem:[%s2484_s29 + $0x10] sm:$0xff]  ;;  %v374_v21 = vld [vmem:[%s2484_s29 + $0x18] sm:$0xff]  ;;  %v416_v23 = vpack.c.bf16 %v402_v18, %v401_v17  ;;  %v403_v25 = vld [vmem:[%s2473_s23 + $0x20] sm:$0xff] }
  0x13   : > { %2025 = vmatmul.mubr.msk.bf16.vlgmr.msra.gmra.mrb[0].mxu1 %vm447_vm0, %v415_v12  ;;  %v388_v24 = vpack.c.bf16 %v374_v21, %v373_v20  ;;  %v404_v26 = vld [vmem:[%s2473_s23 + $0x28] sm:$0xff]  ;;  %v375_v27 = vld [vmem:[%s2484_s29 + $0x20] sm:$0xff]  ;;  %v1293_v33 = vld [vmem:[%s2517_s15 + $0x10] sm:$0xff] }
  0x14   : > { %2037 = vmatmul.mubr.msk.bf16.vlgmr.msra.gmra.mrb[0].mxu0 %vm447_vm0, %v387_v16  ;;  %514 = vmatprep.mubr.bf16.mxu1 %v2389_v2  ;;  %v376_v28 = vld [vmem:[%s2484_s29 + $0x28] sm:$0xff]  ;;  %v417_v29 = vpack.c.bf16 %v404_v26, %v403_v25  ;;  %v1291_v31 = vld [vmem:[%s2517_s15] sm:$0xff]  ;;  %v1294_v34 = vld [vmem:[%s2517_s15 + $0x18] sm:$0xff] }
  0x15   : > { %815 = vmatpush1.bf16.msra.mxu0 %v2183_v15  ;;  %671 = vmatprep.mubr.bf16.mxu0 %v2389_v2  ;;  %v389_v30 = vpack.c.bf16 %v376_v28, %v375_v27  ;;  %v1292_v32 = vld [vmem:[%s2517_s15 + $0x8] sm:$0xff]  ;;  %v405_v35 = vld [vmem:[%s2473_s23 + $0x30] sm:$0xff]  ;;  %v406_v36 = vld [vmem:[%s2473_s23 + $0x38] sm:$0xff] }
  0x16   : > { %2093 = vmatpush1.bf16.msra.mxu1 %v2176_v4  ;;  %816 = vmatprep.subr.bf16.mxu0 %v2188_v19  ;;  %v377_v37 = vld [vmem:[%s2484_s29 + $0x30] sm:$0xff]  ;;  %v378_v38 = vld [vmem:[%s2484_s29 + $0x38] sm:$0xff]  ;;  %v1295_v39 = vld [vmem:[%s2517_s15 + $0x20] sm:$0xff]  ;;  %v418_v41 = vpack.c.bf16 %v406_v36, %v405_v35 }
  0x17   : > { %2092 = vmatprep.subr.bf16.mxu1 %v2179_v6  ;;  %1323 = vrot.lane.b32.xlu1 %v1291_v31, %s2390_s16  ;;  %v1296_v40 = vld [vmem:[%s2517_s15 + $0x28] sm:$0xff]  ;;  %v390_v42 = vpack.c.bf16 %v378_v38, %v377_v37  ;;  %v1297_v43 = vld [vmem:[%s2517_s15 + $0x30] sm:$0xff]  ;;  %v1298_v44 = vld [vmem:[%s2517_s15 + $0x38] sm:$0xff] }
  0x18   : > { %1325 = vrot.lane.b32.xlu0 %v1292_v32, %s2390_s16  ;;  %v407_v45 = vld [vmem:[%s2473_s23 + $0x40] sm:$0xff]  ;;  %v408_v46 = vld [vmem:[%s2473_s23 + $0x48] sm:$0xff]  ;;  %v1301_v53 = vld [vmem:[%s2517_s15 + $0x50] sm:$0xff] }
  0x19   : > { %817 = vmatpush1.bf16.msra.mxu0 %v2186_v22  ;;  %v742_v47 = vld [vmem:[%s2541_s19] sm:$0xff]  ;;  %v743_v48 = vld [vmem:[%s2541_s19 + $0x8] sm:$0xff]  ;;  %v419_v51 = vpack.c.bf16 %v408_v46, %v407_v45  ;;  %v1302_v54 = vld [vmem:[%s2517_s15 + $0x58] sm:$0xff] }
  0x1a   : > { %2094 = vmatpush1.bf16.msra.mxu1 %v2182_v8  ;;  %v1299_v49 = vld [vmem:[%s2517_s15 + $0x40] sm:$0xff]  ;;  %v1300_v50 = vld [vmem:[%s2517_s15 + $0x48] sm:$0xff]  ;;  %v758_v52 = vpack.c.bf16 %v743_v48, %v742_v47  ;;  %v409_v55 = vld [vmem:[%s2473_s23 + $0x50] sm:$0xff] }
  0x1b   : > { %2026 = vmatmul.mubr.msk.bf16.gmra.mrb[4].mxu1 %vm447_vm0, %v416_v23  ;;  %1327 = vrot.lane.b32.xlu1 %v1293_v33, %s2390_s16  ;;  %v410_v56 = vld [vmem:[%s2473_s23 + $0x58] sm:$0xff]  ;;  %v744_v57 = vld [vmem:[%s2541_s19 + $0x10] sm:$0xff]  ;;  %v1303_v59 = vld [vmem:[%s2517_s15 + $0x60] sm:$0xff] }
  0x1c   : > { %2038 = vmatmul.mubr.msk.bf16.gmra.mrb[4].mxu0 %vm447_vm0, %v388_v24  ;;  %524 = vmatprep.mubr.bf16.mxu1 %v2389_v2  ;;  %v745_v58 = vld [vmem:[%s2541_s19 + $0x18] sm:$0xff]  ;;  %v1304_v60 = vld [vmem:[%s2517_s15 + $0x68] sm:$0xff]  ;;  %v420_v61 = vpack.c.bf16 %v410_v56, %v409_v55  ;;  %v1305_v63 = vld [vmem:[%s2517_s15 + $0x70] sm:$0xff] }
  0x1d   : > { %681 = vmatprep.mubr.bf16.mxu0 %v2389_v2  ;;  %1329 = vrot.lane.b32.xlu0 %v1294_v34, %s2390_s16  ;;  %v759_v62 = vpack.c.bf16 %v745_v58, %v744_v57  ;;  %v1306_v0 = vld [vmem:[%s2517_s15 + $0x78] sm:$0xff]  ;;  %v411_v1 = vld [vmem:[%s2473_s23 + $0x60] sm:$0xff]  ;;  %v412_v3 = vld [vmem:[%s2473_s23 + $0x68] sm:$0xff] }
  0x1e   : > { %v746_v4 = vld [vmem:[%s2541_s19 + $0x20] sm:$0xff]  ;;  %v747_v5 = vld [vmem:[%s2541_s19 + $0x28] sm:$0xff]  ;;  %v421_v8 = vpack.c.bf16 %v412_v3, %v411_v1  ;;  %v1469_v10 = vld [vmem:[%s2586_s25 + $0x10] sm:$0xff] }
  0x1f   : > { %1331 = vrot.lane.b32.xlu1 %v1295_v39, %s2390_s16  ;;  %v1467_v6 = vld [vmem:[%s2586_s25] sm:$0xff]  ;;  %v1468_v7 = vld [vmem:[%s2586_s25 + $0x8] sm:$0xff]  ;;  %v760_v9 = vpack.c.bf16 %v747_v5, %v746_v4  ;;  %v1470_v11 = vld [vmem:[%s2586_s25 + $0x18] sm:$0xff] }
  0x20   : > { %v413_v12 = vld [vmem:[%s2473_s23 + $0x70] sm:$0xff]  ;;  %v414_v13 = vld [vmem:[%s2473_s23 + $0x78] sm:$0xff]  ;;  %v1471_v16 = vld [vmem:[%s2586_s25 + $0x20] sm:$0xff] }
  0x21   : > { %1333 = vrot.lane.b32.xlu0 %v1296_v40, %s2390_s16  ;;  %v748_v14 = vld [vmem:[%s2541_s19 + $0x30] sm:$0xff]  ;;  %v749_v15 = vld [vmem:[%s2541_s19 + $0x38] sm:$0xff]  ;;  %v1472_v17 = vld [vmem:[%s2586_s25 + $0x28] sm:$0xff]  ;;  %v422_v18 = vpack.c.bf16 %v414_v13, %v413_v12 }
  0x22   : > { %v761_v19 = vpack.c.bf16 %v749_v15, %v748_v14  ;;  %v1473_v20 = vld [vmem:[%s2586_s25 + $0x30] sm:$0xff]  ;;  %v1474_v21 = vld [vmem:[%s2586_s25 + $0x38] sm:$0xff]  ;;  %v379_v22 = vld [vmem:[%s2484_s29 + $0x40] sm:$0xff] }
  0x23   : > { %2027 = vmatmul.mubr.msk.bf16.gmra.mrb[8].mxu1 %vm447_vm0, %v417_v29  ;;  %1335 = vrot.lane.b32.xlu1 %v1297_v43, %s2390_s16  ;;  %v380_v23 = vld [vmem:[%s2484_s29 + $0x48] sm:$0xff]  ;;  %v750_v24 = vld [vmem:[%s2541_s19 + $0x40] sm:$0xff]  ;;  %v1478_v31 = vld [vmem:[%s2586_s25 + $0x58] sm:$0xff] }
  0x24   : > { %2039 = vmatmul.mubr.msk.bf16.gmra.mrb[8].mxu0 %vm447_vm0, %v389_v30  ;;  %534 = vmatprep.mubr.bf16.mxu1 %v2389_v2  ;;  %v751_v25 = vld [vmem:[%s2541_s19 + $0x48] sm:$0xff]  ;;  %v1475_v26 = vld [vmem:[%s2586_s25 + $0x40] sm:$0xff]  ;;  %v391_v28 = vpack.c.bf16 %v380_v23, %v379_v22  ;;  %v1477_v30 = vld [vmem:[%s2586_s25 + $0x50] sm:$0xff] }
  0x25   : > { %691 = vmatprep.mubr.bf16.mxu0 %v2389_v2  ;;  %1337 = vrot.lane.b32.xlu0 %v1298_v44, %s2390_s16  ;;  %v1476_v27 = vld [vmem:[%s2586_s25 + $0x48] sm:$0xff]  ;;  %v762_v29 = vpack.c.bf16 %v751_v25, %v750_v24  ;;  %v381_v32 = vld [vmem:[%s2484_s29 + $0x50] sm:$0xff]  ;;  %v382_v33 = vld [vmem:[%s2484_s29 + $0x58] sm:$0xff] }
  0x26   : > { %v752_v34 = vld [vmem:[%s2541_s19 + $0x50] sm:$0xff]  ;;  %v753_v35 = vld [vmem:[%s2541_s19 + $0x58] sm:$0xff]  ;;  %v1479_v36 = vld [vmem:[%s2586_s25 + $0x60] sm:$0xff]  ;;  %v392_v38 = vpack.c.bf16 %v382_v33, %v381_v32 }
  0x27   : > { %1339 = vrot.lane.b32.xlu1 %v1299_v49, %s2390_s16  ;;  %v1480_v37 = vld [vmem:[%s2586_s25 + $0x68] sm:$0xff]  ;;  %v763_v39 = vpack.c.bf16 %v753_v35, %v752_v34  ;;  %v1481_v40 = vld [vmem:[%s2586_s25 + $0x70] sm:$0xff]  ;;  %v754_v44 = vld [vmem:[%s2541_s19 + $0x60] sm:$0xff] }
  0x28   : > { %v384_v43 = vld [vmem:[%s2484_s29 + $0x68] sm:$0xff]  ;;  %v385_v48 = vld [vmem:[%s2484_s29 + $0x70] sm:$0xff]  ;;  %v386_v49 = vld [vmem:[%s2484_s29 + $0x78] sm:$0xff] }
  0x29   : > { %1341 = vrot.lane.b32.xlu0 %v1300_v50, %s2390_s16  ;;  %v755_v45 = vld [vmem:[%s2541_s19 + $0x68] sm:$0xff]  ;;  %v756_v50 = vld [vmem:[%s2541_s19 + $0x70] sm:$0xff]  ;;  %v959_v56 = vld [vmem:[%s3124_s6] sm:$0x3] }
  0x2a   : > { %v764_v47 = vpack.c.bf16 %v755_v45, %v754_v44 }
  0x2b   : > { %2028 = vmatmul.mubr.msk.bf16.gmra.mrb[12].mxu1 %vm447_vm0, %v418_v41  ;;  %1343 = vrot.lane.b32.xlu1 %v1301_v53, %s2390_s16  ;;  %v1482_v41 = vld [vmem:[%s2586_s25 + $0x78] sm:$0xff] }
  0x2c   : > { %2040 = vmatmul.mubr.msk.bf16.gmra.mrb[12].mxu0 %vm447_vm0, %v390_v42  ;;  %544 = vmatprep.mubr.bf16.mxu1 %v2389_v2  ;;  %v383_v42 = vld [vmem:[%s2484_s29 + $0x60] sm:$0xff] }
  0x2d   : > { %846 = vmatprep.mubr.bf16.mxu0 %v2389_v2  ;;  %1345 = vrot.lane.b32.xlu0 %v1302_v54, %s2390_s16  ;;  %v393_v46 = vpack.c.bf16 %v384_v43, %v383_v42  ;;  %v961_v54 = vlaneseq }
  0x2f   : > { %1347 = vrot.lane.b32.xlu1 %v1303_v59, %s2390_s16  ;;  %v962_v55 = vshrl.u32 %v961_v54, 7 }
  0x31   : > { %1349 = vrot.lane.b32.xlu0 %v1304_v60, %s2390_s16  ;;  %v967_v57 = vsub.s32 1, %v962_v55  ;;  %v963_v13 = vsub.s32 0, %v962_v55 }
  0x33   : > { %2029 = vmatmul.mubr.msk.bf16.gmra.mrb[16].mxu1 %vm447_vm0, %v419_v51  ;;  %1351 = vrot.lane.b32.xlu1 %v1305_v63, %s2390_s16  ;;  %v757_v51 = vld [vmem:[%s2541_s19 + $0x78] sm:$0xff]  ;;  %v2672_v58 = vrot.slane %v959_v56, %v967_v57 }
  0x34   : > { %2049 = vmatmul.mubr.msk.bf16.vlgmr.msra.gmra.mrb[0].mxu0 %vm447_vm0, %v758_v52  ;;  %554 = vmatprep.mubr.bf16.mxu1 %v2389_v2  ;;  %v394_v52 = vpack.c.bf16 %v386_v49, %v385_v48  ;;  %v765_v53 = vpack.c.bf16 %v757_v51, %v756_v50 }
  0x35   : > { %856 = vmatprep.mubr.bf16.mxu0 %v2389_v2  ;;  %1353 = vrot.lane.b32.xlu0 %v1306_v0, %s2390_s16 }
  0x37   : > { %1499 = vrot.lane.b32.xlu1 %v1467_v6, %s2391_s26 }
  0x39   : > { %1501 = vrot.lane.b32.xlu0 %v1468_v7, %s2391_s26 }
  0x3b   : > { %2030 = vmatmul.mubr.msk.bf16.gmra.mrb[20].mxu1 %vm447_vm0, %v420_v61  ;;  %1503 = vrot.lane.b32.xlu1 %v1469_v10, %s2391_s26 }
  0x3c   : > { %2050 = vmatmul.mubr.msk.bf16.gmra.mrb[4].mxu0 %vm447_vm0, %v759_v62  ;;  %564 = vmatprep.mubr.bf16.mxu1 %v2389_v2 }
  0x3d   : > { %866 = vmatprep.mubr.bf16.mxu0 %v2389_v2  ;;  %1505 = vrot.lane.b32.xlu0 %v1470_v11, %s2391_s26 }
  0x3f   : > { %1507 = vrot.lane.b32.xlu1 %v1471_v16, %s2391_s26  ;;  %v2694_v16 = vrot.slane %v959_v56, %v963_v13 }
  0x41   : > { %1509 = vrot.lane.b32.xlu0 %v1472_v17, %s2391_s26 }
  0x43   : > { %2031 = vmatmul.mubr.msk.bf16.gmra.mrb[24].mxu1 %vm447_vm0, %v421_v8  ;;  %1511 = vrot.lane.b32.xlu1 %v1473_v20, %s2391_s26 }
  0x44   : > { %2051 = vmatmul.mubr.msk.bf16.gmra.mrb[8].mxu0 %vm447_vm0, %v760_v9  ;;  %574 = vmatprep.mubr.bf16.mxu1 %v2389_v2 }
  0x45   : > { %876 = vmatprep.mubr.bf16.mxu0 %v2389_v2  ;;  %1513 = vrot.lane.b32.xlu0 %v1474_v21, %s2391_s26 }
  0x47   : > { %1515 = vrot.lane.b32.xlu1 %v1475_v26, %s2391_s26 }
  0x49   : > { %1517 = vrot.lane.b32.xlu0 %v1476_v27, %s2391_s26 }
  0x4b   : > { %2032 = vmatmul.mubr.msk.bf16.gmra.mrb[28].mxu1 %vm447_vm0, %v422_v18  ;;  %1519 = vrot.lane.b32.xlu1 %v1477_v30, %s2391_s26 }
  0x4c   : > { %2052 = vmatmul.mubr.msk.bf16.gmra.mrb[12].mxu0 %vm447_vm0, %v761_v19  ;;  %701 = vmatprep.mubr.bf16.mxu1 %v2389_v2 }
  0x4d   : > { %886 = vmatprep.mubr.bf16.mxu0 %v2389_v2  ;;  %1521 = vrot.lane.b32.xlu0 %v1478_v31, %s2391_s26 }
  0x4f   : > { %1523 = vrot.lane.b32.xlu1 %v1479_v36, %s2391_s26 }
  0x51   : > { %1525 = vrot.lane.b32.xlu0 %v1480_v37, %s2391_s26 }
  0x53   : > { %2041 = vmatmul.mubr.msk.bf16.vlgmr.msra.gmra.mrb[16].mxu1 %vm447_vm0, %v391_v28  ;;  %1527 = vrot.lane.b32.xlu1 %v1481_v40, %s2391_s26 }
  0x54   : > { %2053 = vmatmul.mubr.msk.bf16.gmra.mrb[16].mxu0 %vm447_vm0, %v762_v29  ;;  %711 = vmatprep.mubr.bf16.mxu1 %v2389_v2 }
  0x55   : > { %896 = vmatprep.mubr.bf16.mxu0 %v2389_v2  ;;  %1529 = vrot.lane.b32.xlu0 %v1482_v41, %s2391_s26 }
  0x5b   : > { %2042 = vmatmul.mubr.msk.bf16.gmra.mrb[20].mxu1 %vm447_vm0, %v392_v38 }
  0x5c   : > { %2054 = vmatmul.mubr.msk.bf16.gmra.mrb[20].mxu0 %vm447_vm0, %v763_v39  ;;  %721 = vmatprep.mubr.bf16.mxu1 %v2389_v2 }
  0x5d   : > { %906 = vmatprep.mubr.bf16.mxu0 %v2389_v2 }
  0x63   : > { %2043 = vmatmul.mubr.msk.bf16.gmra.mrb[24].mxu1 %vm447_vm0, %v393_v46 }
  0x64   : > { %2055 = vmatmul.mubr.msk.bf16.gmra.mrb[24].mxu0 %vm447_vm0, %v764_v47  ;;  %731 = vmatprep.mubr.bf16.mxu1 %v2389_v2 }
  0x65   : > { %916 = vmatprep.mubr.bf16.mxu0 %v2389_v2 }
  0x6b   : > { %2044 = vmatmul.mubr.msk.bf16.gmra.mrb[28].mxu1 %vm447_vm0, %v394_v52 }
  0x6c   : > { %2056 = vmatmul.mubr.msk.bf16.gmra.mrb[28].mxu0 %vm447_vm0, %v765_v53 }
  0x89   : > { %v2678_v7 = vpop.permute.xlu1 %1323 }
  0x8a   : > { %v2680_v8 = vpop.permute.xlu0 %1325 }
  0x8d   : > { %v2688_v12 = vpop.permute.xlu1 %1327 }
  0x8f   : > { %v2692_v15 = vpop.permute.xlu0 %1329 }
  0x91   : > { %v2696_v18 = vpop.permute.xlu1 %1331 }
  0x93   : > { %v2698_v21 = vpop.permute.xlu0 %1333 }
  0x95   : > { %v2708_v32 = vpop.permute.xlu1 %1335 }
  0x97   : > { %v2710_v34 = vpop.permute.xlu0 %1337 }
  0x99   : > { %v2716_v45 = vpop.permute.xlu1 %1339 }
  0x9b   : > { %v2719_v48 = vpop.permute.xlu0 %1341 }
  0xe6   : > { %v506_v59 = vpop.f32.mrb[0].mxu1 }
  0xe7   : > { %v508_v2 = vpop.f32.mrb[1].mxu1 }
  0xe8   : > { %v510_v60 = vpop.f32.mrb[2].mxu1 }
  0xe9   : > { %v512_v61 = vpop.f32.mrb[3].mxu1 }
  0xee   : > { %v516_v62 = vpop.f32.mrb[4].mxu1 }
  0xef   : > { %v518_v63 = vpop.f32.mrb[5].mxu1 }
  0xf0   : > { %v520_v0 = vpop.f32.mrb[6].mxu1 }
  0xf1   : > { %v522_v1 = vpop.f32.mrb[7].mxu1 }
  0xf6   : > { %v526_v3 = vpop.f32.mrb[8].mxu1 }
  0xf7   : > { %v528_v4 = vpop.f32.mrb[9].mxu1 }
  0xf8   : > { %v2674_v5 = vpop.f32.mrb[10].mxu1 }
  0xf9   : > { %v2676_v6 = vpop.f32.mrb[11].mxu1 }
  0xfe   : > { %v2682_v9 = vpop.f32.mrb[12].mxu1 }
  0xff   : > { %v2684_v10 = vpop.f32.mrb[13].mxu1 }
 0x100   : > { %v2686_v11 = vpop.f32.mrb[14].mxu1 }
 0x101   : > { %v2690_v14 = vpop.f32.mrb[15].mxu1 }
 0x107   : > { %v848_v17 = vpop.f32.mrb[0].mxu0 }
 0x108   : > { %v2095_v19 = vadd.f32 %v848_v17, %v506_v59  ;;  %v850_v20 = vpop.f32.mrb[1].mxu0  ;;  %v2725_v59 = vpop.permute.xlu1 %1343 }
 0x109   : > { %v2096_v22 = vadd.f32 %v850_v20, %v508_v2  ;;  %v852_v23 = vpop.f32.mrb[2].mxu0 }
 0x10a   : > { %v971_v24 = vadd.f32 %v2095_v19, %v2694_v16  ;;  %v2097_v25 = vadd.f32 %v852_v23, %v510_v60  ;;  %v854_v26 = vpop.f32.mrb[3].mxu0 }
 0x10b   : > { %v2702_v27 = vadd.f32 %v2096_v22, %v2672_v58  ;;  %v2098_v28 = vadd.f32 %v854_v26, %v512_v61 }
 0x10c   : > { %2189 = vtanh.f32 %v971_v24  ;;  %v2057_v29 = vmul.f32 -1.442695, %v971_v24  ;;  %v973_v30 = vadd.f32 %v2097_v25, %v2694_v16  ;;  %v2740_v22 = vpop.permute.xlu1 %1347 }
 0x10d   : > { %v2706_v31 = vadd.f32 %v2098_v28, %v2672_v58 }
 0x10e   : > { %2191 = vpow2.f32 %v2057_v29  ;;  %v2059_v33 = vmul.f32 -1.442695, %v973_v30 }
 0x10f   : > { %v858_v35 = vpop.f32.mrb[4].mxu0  ;;  %2193 = vtanh.f32 %v973_v30 }
 0x110   : > { %v2099_v36 = vadd.f32 %v858_v35, %v516_v62  ;;  %v860_v37 = vpop.f32.mrb[5].mxu0  ;;  %2195 = vpow2.f32 %v2059_v33 }
 0x111   : > { %v2100_v38 = vadd.f32 %v860_v37, %v518_v63  ;;  %v862_v39 = vpop.f32.mrb[6].mxu0 }
 0x112   : > { %v975_v40 = vadd.f32 %v2099_v36, %v2694_v16  ;;  %v2101_v41 = vadd.f32 %v862_v39, %v520_v0  ;;  %v864_v42 = vpop.f32.mrb[7].mxu0  ;;  %v2729_v0 = vpop.permute.xlu0 %1345 }
 0x113   : > { %v2714_v43 = vadd.f32 %v2100_v38, %v2672_v58  ;;  %v2102_v44 = vadd.f32 %v864_v42, %v522_v1 }
 0x114   : > { %2197 = vtanh.f32 %v975_v40  ;;  %v2061_v46 = vmul.f32 -1.442695, %v975_v40  ;;  %v977_v47 = vadd.f32 %v2101_v41, %v2694_v16 }
 0x115   : > { %v2722_v49 = vadd.f32 %v2102_v44, %v2672_v58 }
 0x116   : > { %v2190_v50 = vpop.eup %2189  ;;  %2199 = vpow2.f32 %v2061_v46  ;;  %v2063_v51 = vmul.f32 -1.442695, %v977_v47  ;;  %v2743_v25 = vpop.permute.xlu0 %1349 }
 0x117   : > { %1227 = vrot.lane.b32.xlu0 %v2190_v50, %s2392_s28  ;;  %v868_v52 = vpop.f32.mrb[8].mxu0  ;;  %2201 = vtanh.f32 %v977_v47 }
 0x118   : > { %v2192_v53 = vpop.eup %2191  ;;  %v2103_v54 = vadd.f32 %v868_v52, %v526_v3  ;;  %v870_v55 = vpop.f32.mrb[9].mxu0  ;;  %2203 = vpow2.f32 %v2063_v51 }
 0x119   : > { %v1115_v56 = vadd.f32 1.0, %v2192_v53  ;;  %v2104_v57 = vadd.f32 %v870_v55, %v528_v4  ;;  %v872_v2 = vpop.f32.mrb[10].mxu0  ;;  %v2194_v60 = vpop.eup %2193 }
 0x11a   : > { %v979_v61 = vadd.f32 %v2103_v54, %v2694_v16  ;;  %v2105_v62 = vadd.f32 %v872_v2, %v2674_v5  ;;  %v874_v63 = vpop.f32.mrb[11].mxu0  ;;  %v2196_v1 = vpop.eup %2195 }
 0x11b   : > { %v2732_v13 = vadd.f32 %v2104_v57, %v2672_v58  ;;  %v2106_v3 = vadd.f32 %v874_v63, %v2676_v6  ;;  %1229 = vrot.lane.b32.xlu0 %v2194_v60, %s2392_s28  ;;  %2205 = vrcp.f32 %v1115_v56  ;;  %v1117_v4 = vadd.f32 1.0, %v2196_v1  ;;  %v2761_v42 = vpop.permute.xlu0 %1353 }
 0x11c   : > { %2207 = vtanh.f32 %v979_v61  ;;  %v981_v5 = vadd.f32 %v2105_v62, %v2694_v16  ;;  %v2065_v20 = vmul.f32 -1.442695, %v979_v61 }
 0x11d   : > { %v2737_v17 = vadd.f32 %v2106_v3, %v2672_v58  ;;  %2209 = vrcp.f32 %v1117_v4 }
 0x11e   : > { %v2198_v19 = vpop.eup %2197  ;;  %2211 = vtanh.f32 %v981_v5 }
 0x11f   : > { %1231 = vrot.lane.b32.xlu1 %v2198_v19, %s2392_s28  ;;  %v878_v23 = vpop.f32.mrb[12].mxu0  ;;  %2213 = vpow2.f32 %v2065_v20 }
 0x120   : > { %v2200_v24 = vpop.eup %2199  ;;  %v2107_v6 = vadd.f32 %v878_v23, %v2682_v9  ;;  %v880_v26 = vpop.f32.mrb[13].mxu0  ;;  %v2067_v9 = vmul.f32 -1.442695, %v981_v5 }
 0x121   : > { %v2108_v28 = vadd.f32 %v880_v26, %v2684_v10  ;;  %v882_v29 = vpop.f32.mrb[14].mxu0  ;;  %v2202_v30 = vpop.eup %2201  ;;  %v1119_v36 = vadd.f32 1.0, %v2200_v24 }
 0x122   : > { %v2109_v33 = vadd.f32 %v882_v29, %v2686_v11  ;;  %v884_v35 = vpop.f32.mrb[15].mxu0  ;;  %v2204_v39 = vpop.eup %2203  ;;  %v983_v40 = vadd.f32 %v2107_v6, %v2694_v16 }
 0x123   : > { %v2749_v37 = vadd.f32 %v2108_v28, %v2672_v58  ;;  %v2110_v38 = vadd.f32 %v884_v35, %v2690_v14  ;;  %1233 = vrot.lane.b32.xlu1 %v2202_v30, %s2392_s28  ;;  %v2754_v10 = vpop.permute.xlu1 %1351  ;;  %2215 = vrcp.f32 %v1119_v36  ;;  %v1121_v14 = vadd.f32 1.0, %v2204_v39  ;;  %v1502_v23 = vpop.permute.xlu0 %1501 }
 0x124   : > { %2217 = vpow2.f32 %v2067_v9  ;;  %v2069_v53 = vmul.f32 -1.442695, %v983_v40  ;;  %v985_v57 = vadd.f32 %v2109_v33, %v2694_v16 }
 0x125   : > { %v2757_v41 = vadd.f32 %v2110_v38, %v2672_v58  ;;  %v2759_v11 = vpop.eup %2205  ;;  %2219 = vtanh.f32 %v983_v40 }
 0x126   : > { %v2208_v44 = vpop.eup %2207  ;;  %v703_v46 = vpop.f32.mrb[16].mxu1  ;;  %v1371_v62 = vmul.f32 %v2759_v11, %v2678_v7  ;;  %2221 = vrcp.f32 %v1121_v14  ;;  %v2071_v24 = vmul.f32 -1.442695, %v985_v57 }
 0x127   : > { %v888_v47 = vpop.f32.mrb[16].mxu0  ;;  %1235 = vrot.lane.b32.xlu0 %v2208_v44, %s2392_s28  ;;  %v705_v51 = vpop.f32.mrb[17].mxu1  ;;  %2223 = vpow2.f32 %v2069_v53 }
 0x128   : > { %v2111_v50 = vadd.f32 %v888_v47, %v703_v46  ;;  %v890_v52 = vpop.f32.mrb[17].mxu0  ;;  %v707_v55 = vpop.f32.mrb[18].mxu1  ;;  %2225 = vtanh.f32 %v985_v57 }
 0x129   : > { %v2112_v54 = vadd.f32 %v890_v52, %v705_v51  ;;  %v892_v56 = vpop.f32.mrb[18].mxu0  ;;  %v709_v60 = vpop.f32.mrb[19].mxu1  ;;  %2227 = vpow2.f32 %v2071_v24 }
 0x12a   : > { %v2113_v2 = vadd.f32 %v892_v56, %v707_v55  ;;  %v894_v61 = vpop.f32.mrb[19].mxu0  ;;  %v2767_v63 = vpop.eup %2209  ;;  %v987_v38 = vadd.f32 %v2111_v50, %v2694_v16 }
 0x12b   : > { %v1500_v1 = vpop.permute.xlu1 %1499  ;;  %v2770_v3 = vadd.f32 %v2112_v54, %v2672_v58  ;;  %v2114_v4 = vadd.f32 %v894_v61, %v709_v60  ;;  %v2212_v19 = vpop.eup %2211  ;;  %1403 = vrot.lane.b32.xlu0 %v1371_v62, %s2391_s26  ;;  %v1372_v6 = vmul.f32 %v2767_v63, %v2680_v8  ;;  %v1548_v51 = vmul.f32 %v2767_v63, %v1502_v23 }
 0x12c   : > { %v2214_v5 = vpop.eup %2213  ;;  %1237 = vrot.lane.b32.xlu1 %v2212_v19, %s2392_s28  ;;  %v1547_v7 = vmul.f32 %v2759_v11, %v1500_v1  ;;  %v989_v56 = vadd.f32 %v2113_v2, %v2694_v16  ;;  %v2073_v62 = vmul.f32 -1.442695, %v987_v38 }
 0x12d   : > { %v2775_v20 = vadd.f32 %v2114_v4, %v2672_v58  ;;  %v1123_v29 = vadd.f32 1.0, %v2214_v5  ;;  %v2781_v36 = vpop.eup %2215 }
 0x12e   : > { %v713_v26 = vpop.f32.mrb[20].mxu1  ;;  %v2218_v44 = vpop.eup %2217  ;;  %v1373_v60 = vmul.f32 %v2781_v36, %v2688_v12 }
 0x12f   : > { %v898_v28 = vpop.f32.mrb[20].mxu0  ;;  %1579 = vrot.lane.b32.xlu0 %v1547_v7, %s2390_s16  ;;  %v715_v33 = vpop.f32.mrb[21].mxu1  ;;  %2229 = vrcp.f32 %v1123_v29  ;;  %v1125_v50 = vadd.f32 1.0, %v2218_v44 }
 0x130   : > { %v2115_v30 = vadd.f32 %v898_v28, %v713_v26  ;;  %v900_v35 = vpop.f32.mrb[21].mxu0  ;;  %1405 = vrot.lane.b32.xlu1 %v1372_v6, %s2391_s26  ;;  %v717_v39 = vpop.f32.mrb[22].mxu1  ;;  %2231 = vtanh.f32 %v987_v38 }
 0x131   : > { %v2116_v9 = vadd.f32 %v900_v35, %v715_v33  ;;  %v902_v40 = vpop.f32.mrb[22].mxu0  ;;  %v719_v8 = vpop.f32.mrb[23].mxu1  ;;  %2233 = vrcp.f32 %v1125_v50 }
 0x132   : > { %v2785_v46 = vadd.f32 %v902_v40, %v717_v39  ;;  %v904_v47 = vpop.f32.mrb[23].mxu0  ;;  %v2220_v14 = vpop.eup %2219  ;;  %2235 = vtanh.f32 %v989_v56  ;;  %v2075_v40 = vmul.f32 -1.442695, %v989_v56 }
 0x133   : > { %v2789_v52 = vadd.f32 %v2116_v9, %v2672_v58  ;;  %v2118_v53 = vadd.f32 %v904_v47, %v719_v8  ;;  %1239 = vrot.lane.b32.xlu0 %v2220_v14, %s2392_s28  ;;  %v2796_v55 = vpop.eup %2221  ;;  %v1504_v57 = vpop.permute.xlu1 %1503  ;;  %2237 = vpow2.f32 %v2073_v62  ;;  %v991_v14 = vadd.f32 %v2115_v30, %v2694_v16 }
 0x134   : > { %1581 = vrot.lane.b32.xlu1 %v1548_v51, %s2390_s16  ;;  %v2224_v61 = vpop.eup %2223  ;;  %v1549_v24 = vmul.f32 %v2781_v36, %v1504_v57  ;;  %v1374_v28 = vmul.f32 %v2796_v55, %v2692_v15  ;;  %v1506_v44 = vpop.permute.xlu0 %1505 }
 0x135   : > { %v2794_v54 = vadd.f32 %v2118_v53, %v2672_v58  ;;  %v2226_v19 = vpop.eup %2225  ;;  %v1127_v38 = vadd.f32 1.0, %v2224_v61  ;;  %v1550_v50 = vmul.f32 %v2796_v55, %v1506_v44 }
 0x136   : > { %v723_v1 = vpop.f32.mrb[24].mxu1  ;;  %v2228_v47 = vpop.eup %2227 }
 0x137   : > { %v908_v4 = vpop.f32.mrb[24].mxu0  ;;  %1407 = vrot.lane.b32.xlu0 %v1373_v60, %s2391_s26  ;;  %v725_v7 = vpop.f32.mrb[25].mxu1  ;;  %2239 = vrcp.f32 %v1127_v38  ;;  %v1129_v60 = vadd.f32 1.0, %v2228_v47 }
 0x138   : > { %v2119_v5 = vadd.f32 %v908_v4, %v723_v1  ;;  %v910_v23 = vpop.f32.mrb[25].mxu0  ;;  %1241 = vrot.lane.b32.xlu1 %v2226_v19, %s2392_s28  ;;  %v727_v6 = vpop.f32.mrb[26].mxu1  ;;  %2241 = vpow2.f32 %v2075_v40  ;;  %v2077_v1 = vmul.f32 -1.442695, %v991_v14 }
 0x139   : > { %v2120_v2 = vadd.f32 %v910_v23, %v725_v7  ;;  %v912_v26 = vpop.f32.mrb[26].mxu0  ;;  %v729_v33 = vpop.f32.mrb[27].mxu1  ;;  %2243 = vtanh.f32 %v991_v14  ;;  %v993_v7 = vadd.f32 %v2785_v46, %v2694_v16 }
 0x13a   : > { %v2805_v12 = vadd.f32 %v2119_v5, %v2694_v16  ;;  %v2121_v29 = vadd.f32 %v912_v26, %v727_v6  ;;  %v914_v35 = vpop.f32.mrb[27].mxu0  ;;  %v2821_v51 = vpop.eup %2229  ;;  %2245 = vrcp.f32 %v1129_v60 }
 0x13b   : > { %v2810_v9 = vadd.f32 %v2120_v2, %v2672_v58  ;;  %v2122_v39 = vadd.f32 %v914_v35, %v729_v33  ;;  %1583 = vrot.lane.b32.xlu0 %v1549_v24, %s2390_s16  ;;  %v2232_v53 = vpop.eup %2231  ;;  %v1375_v26 = vmul.f32 %v2821_v51, %v2696_v18  ;;  %2247 = vpow2.f32 %v2077_v1 }
 0x13c   : > { %v2813_v8 = vadd.f32 %v2121_v29, %v2694_v16  ;;  %1409 = vrot.lane.b32.xlu1 %v1374_v28, %s2391_s26  ;;  %v2831_v28 = vpop.eup %2233  ;;  %v1508_v29 = vpop.permute.xlu1 %1507  ;;  %2249 = vtanh.f32 %v993_v7  ;;  %v2079_v44 = vmul.f32 -1.442695, %v993_v7 }
 0x13d   : > { %v2819_v15 = vadd.f32 %v2122_v39, %v2672_v58  ;;  %v2236_v38 = vpop.eup %2235  ;;  %v1551_v40 = vmul.f32 %v2821_v51, %v1508_v29  ;;  %v1376_v47 = vmul.f32 %v2831_v28, %v2698_v21 }
 0x13e   : > { %v733_v56 = vpop.f32.mrb[28].mxu1  ;;  %v2238_v46 = vpop.eup %2237  ;;  %2251 = vpow2.f32 %v2079_v44 }
 0x13f   : > { %v918_v57 = vpop.f32.mrb[28].mxu0  ;;  %1243 = vrot.lane.b32.xlu0 %v2232_v53, %s2392_s28  ;;  %v735_v62 = vpop.f32.mrb[29].mxu1  ;;  %v1131_v14 = vadd.f32 1.0, %v2238_v46 }
 0x140   : > { %v2123_v61 = vadd.f32 %v918_v57, %v733_v56  ;;  %v920_v30 = vpop.f32.mrb[29].mxu0  ;;  %1585 = vrot.lane.b32.xlu1 %v1550_v50, %s2390_s16  ;;  %v737_v19 = vpop.f32.mrb[30].mxu1  ;;  %v2081_v57 = vmul.f32 -1.442695, %v2805_v12 }
 0x141   : > { %v2124_v4 = vadd.f32 %v920_v30, %v735_v62  ;;  %v922_v5 = vpop.f32.mrb[30].mxu0  ;;  %v739_v2 = vpop.f32.mrb[31].mxu1  ;;  %2253 = vrcp.f32 %v1131_v14 }
 0x142   : > { %v999_v23 = vadd.f32 %v2123_v61, %v2694_v16  ;;  %v2125_v24 = vadd.f32 %v922_v5, %v737_v19  ;;  %v924_v6 = vpop.f32.mrb[31].mxu0  ;;  %v1510_v53 = vpop.permute.xlu0 %1509  ;;  %2255 = vtanh.f32 %v2805_v12 }
 0x143   : > { %v2834_v33 = vadd.f32 %v2124_v4, %v2672_v58  ;;  %v2126_v35 = vadd.f32 %v924_v6, %v739_v2  ;;  %1411 = vrot.lane.b32.xlu0 %v1375_v26, %s2391_s26  ;;  %v1512_v30 = vpop.permute.xlu1 %1511  ;;  %2257 = vpow2.f32 %v2081_v57  ;;  %v2083_v4 = vmul.f32 -1.442695, %v2813_v8 }
 0x144   : > { %v2837_v39 = vadd.f32 %v2125_v24, %v2694_v16  ;;  %1245 = vrot.lane.b32.xlu1 %v2236_v38, %s2392_s28  ;;  %v2848_v16 = vpop.eup %2239  ;;  %v2085_v7 = vmul.f32 -1.442695, %v999_v23 }
 0x145   : > { %v2842_v18 = vadd.f32 %v2126_v35, %v2672_v58  ;;  %v2242_v50 = vpop.eup %2241  ;;  %v1552_v58 = vmul.f32 %v2831_v28, %v1510_v53  ;;  %v1377_v61 = vmul.f32 %v2848_v16, %v2708_v32  ;;  %v1553_v12 = vmul.f32 %v2848_v16, %v1512_v30 }
 0x146   : > { %v2244_v56 = vpop.eup %2243  ;;  %v1133_v60 = vadd.f32 1.0, %v2242_v50  ;;  %v1514_v32 = vpop.permute.xlu0 %1513 }
 0x147   : > { %1587 = vrot.lane.b32.xlu0 %v1551_v40, %s2390_s16  ;;  %v2856_v21 = vpop.eup %2245  ;;  %v1516_v46 = vpop.permute.xlu1 %1515 }
 0x148   : > { %1413 = vrot.lane.b32.xlu1 %v1376_v47, %s2391_s26  ;;  %v2248_v62 = vpop.eup %2247  ;;  %2259 = vrcp.f32 %v1133_v60  ;;  %v1378_v5 = vmul.f32 %v2856_v21, %v2710_v34  ;;  %v2087_v34 = vmul.f32 -1.442695, %v2837_v39 }
 0x149   : > { %v2250_v1 = vpop.eup %2249  ;;  %2261 = vtanh.f32 %v2813_v8  ;;  %v1135_v19 = vadd.f32 1.0, %v2248_v62  ;;  %v1554_v8 = vmul.f32 %v2856_v21, %v1514_v32 }
 0x14a   : > { %v2252_v24 = vpop.eup %2251  ;;  %2263 = vpow2.f32 %v2083_v4 }
 0x14b   : > { %1247 = vrot.lane.b32.xlu0 %v2244_v56, %s2392_s28  ;;  %v2869_v2 = vpop.eup %2253  ;;  %2265 = vrcp.f32 %v1135_v19  ;;  %v1137_v26 = vadd.f32 1.0, %v2252_v24  ;;  %v1520_v62 = vpop.permute.xlu1 %1519 }
 0x14c   : > { %1589 = vrot.lane.b32.xlu1 %v1552_v58, %s2390_s16  ;;  %v2256_v6 = vpop.eup %2255  ;;  %2267 = vpow2.f32 %v2085_v7  ;;  %v1379_v35 = vmul.f32 %v2869_v2, %v2716_v45  ;;  %v1518_v45 = vpop.permute.xlu0 %1517 }
 0x14d   : > { %2269 = vtanh.f32 %v999_v23  ;;  %v2258_v29 = vpop.eup %2257  ;;  %v1555_v23 = vmul.f32 %v2869_v2, %v1516_v46 }
 0x14e   : > { %2271 = vrcp.f32 %v1137_v26  ;;  %v1139_v44 = vadd.f32 1.0, %v2258_v29 }
 0x14f   : > { %1415 = vrot.lane.b32.xlu0 %v1377_v61, %s2391_s26  ;;  %2273 = vpow2.f32 %v2087_v34  ;;  %v1524_v7 = vpop.permute.xlu1 %1523 }
 0x150   : > { %1249 = vrot.lane.b32.xlu1 %v2250_v1, %s2392_s28  ;;  %2275 = vtanh.f32 %v2837_v39 }
 0x151   : > { %2277 = vrcp.f32 %v1139_v44 }
 0x152   : > { %v2877_v38 = vpop.eup %2259 }
 0x153   : > { %1591 = vrot.lane.b32.xlu0 %v1553_v12, %s2390_s16  ;;  %v2262_v40 = vpop.eup %2261  ;;  %v1380_v14 = vmul.f32 %v2877_v38, %v2719_v48  ;;  %v1556_v57 = vmul.f32 %v2877_v38, %v1518_v45  ;;  %v1528_v29 = vpop.permute.xlu1 %1527 }
 0x154   : > { %1417 = vrot.lane.b32.xlu1 %v1378_v5, %s2391_s26  ;;  %v2264_v47 = vpop.eup %2263  ;;  %v1522_v5 = vpop.permute.xlu0 %1521 }
 0x155   : > { %v2886_v53 = vpop.eup %2265  ;;  %v1141_v56 = vadd.f32 1.0, %v2264_v47 }
 0x156   : > { %v2268_v50 = vpop.eup %2267  ;;  %v1381_v48 = vmul.f32 %v2886_v53, %v2725_v59  ;;  %v1557_v4 = vmul.f32 %v2886_v53, %v1520_v62 }
 0x157   : > { %1251 = vrot.lane.b32.xlu0 %v2256_v6, %s2392_s28  ;;  %v2270_v58 = vpop.eup %2269  ;;  %v1143_v39 = vadd.f32 1.0, %v2268_v50  ;;  %2279 = vrcp.f32 %v1141_v56 }
 0x158   : > { %1593 = vrot.lane.b32.xlu1 %v1554_v8, %s2390_s16  ;;  %v2892_v60 = vpop.eup %2271  ;;  %v1526_v26 = vpop.permute.xlu0 %1525 }
 0x159   : > { %v2274_v61 = vpop.eup %2273  ;;  %2281 = vrcp.f32 %v1143_v39  ;;  %v1382_v19 = vmul.f32 %v2892_v60, %v2729_v0  ;;  %v1558_v32 = vmul.f32 %v2892_v60, %v1522_v5 }
 0x15a   : > { %v2276_v30 = vpop.eup %2275  ;;  %v1145_v1 = vadd.f32 1.0, %v2274_v61 }
 0x15b   : > { %1419 = vrot.lane.b32.xlu0 %v1379_v35, %s2391_s26  ;;  %v2899_v12 = vpop.eup %2277 }
 0x15c   : > { %1253 = vrot.lane.b32.xlu1 %v2262_v40, %s2392_s28  ;;  %2283 = vrcp.f32 %v1145_v1  ;;  %v1383_v59 = vmul.f32 %v2899_v12, %v2740_v22  ;;  %v1559_v0 = vmul.f32 %v2899_v12, %v1524_v7  ;;  %v1530_v40 = vpop.permute.xlu0 %1529 }
 0x15f   : > { %1595 = vrot.lane.b32.xlu0 %v1555_v23, %s2390_s16 }
 0x160   : > { %1421 = vrot.lane.b32.xlu1 %v1380_v14, %s2391_s26 }
 0x161   : > { %v2908_v24 = vpop.eup %2279 }
 0x162   : > { %v1384_v8 = vmul.f32 %v2908_v24, %v2743_v25  ;;  %v1560_v34 = vmul.f32 %v2908_v24, %v1526_v26 }
 0x163   : > { %1255 = vrot.lane.b32.xlu0 %v2270_v58, %s2392_s28  ;;  %v2913_v6 = vpop.eup %2281 }
 0x164   : > { %1597 = vrot.lane.b32.xlu1 %v1556_v57, %s2390_s16  ;;  %v1385_v22 = vmul.f32 %v2913_v6, %v2754_v10  ;;  %v1561_v46 = vmul.f32 %v2913_v6, %v1528_v29 }
 0x166   : > { %v2922_v35 = vpop.eup %2283 }
 0x167   : > { %1423 = vrot.lane.b32.xlu0 %v1381_v48, %s2391_s26  ;;  %v1386_v25 = vmul.f32 %v2922_v35, %v2761_v42  ;;  %v1562_v10 = vmul.f32 %v2922_v35, %v1530_v40 }
 0x168   : > { %1257 = vrot.lane.b32.xlu1 %v2276_v30, %s2392_s28 }
 0x16b   : > { %1599 = vrot.lane.b32.xlu0 %v1557_v4, %s2390_s16 }
 0x16c   : > { %1425 = vrot.lane.b32.xlu1 %v1382_v19, %s2391_s26 }
 0x16f   : > { %1427 = vrot.lane.b32.xlu0 %v1383_v59, %s2391_s26 }
 0x170   : > { %1601 = vrot.lane.b32.xlu1 %v1558_v32, %s2390_s16 }
 0x173   : > { %1603 = vrot.lane.b32.xlu0 %v1559_v0, %s2390_s16 }
 0x174   : > { %1429 = vrot.lane.b32.xlu1 %v1384_v8, %s2391_s26 }
 0x177   : > { %1431 = vrot.lane.b32.xlu0 %v1385_v22, %s2391_s26 }
 0x178   : > { %1605 = vrot.lane.b32.xlu1 %v1560_v34, %s2390_s16 }
 0x17b   : > { %1607 = vrot.lane.b32.xlu0 %v1561_v46, %s2390_s16 }
 0x17c   : > { %1433 = vrot.lane.b32.xlu1 %v1386_v25, %s2391_s26 }
 0x180   : > { %1609 = vrot.lane.b32.xlu1 %v1562_v10, %s2390_s16 }
 0x189   : > { %v1228_v44 = vpop.permute.xlu0 %1227 }
 0x18a   : > { %v1275_v56 = vmul.f32 %v2759_v11, %v1228_v44 }
 0x18d   : > { %v1230_v47 = vpop.permute.xlu0 %1229 }
 0x18e   : > { %v1276_v61 = vmul.f32 %v2767_v63, %v1230_v47 }
 0x191   : > { %v1232_v23 = vpop.permute.xlu1 %1231 }
 0x192   : > { %v1277_v11 = vmul.f32 %v2781_v36, %v1232_v23 }
 0x195   : > { %v1234_v45 = vpop.permute.xlu1 %1233 }
 0x196   : > { %v1278_v63 = vmul.f32 %v2796_v55, %v1234_v45 }
 0x199   : > { %v1236_v14 = vpop.permute.xlu0 %1235 }
 0x19a   : > { %v1279_v25 = vmul.f32 %v2821_v51, %v1236_v14 }
 0x19d   : > { %v1404_v50 = vpop.permute.xlu0 %1403 }
 0x19e   : > { %v1238_v58 = vpop.permute.xlu1 %1237  ;;  %v1451_v57 = vadd.f32 %v1404_v50, %v1275_v56 }
 0x19f   : > { %v1280_v45 = vmul.f32 %v2831_v28, %v1238_v58 }
 0x1a1   : > { %v1580_v42 = vpop.permute.xlu0 %1579 }
 0x1a2   : > { %v1406_v39 = vpop.permute.xlu1 %1405  ;;  %v1627_v48 = vadd.f32 %v1580_v42, %v1451_v57 }
 0x1a3   : > { %v1452_v62 = vadd.f32 %v1406_v39, %v1276_v61 }
 0x1a4   : > { %2285 = vtanh.f32 %v1627_v48  ;;  %1755 = vrot.lane.b32.xlu0 %v1627_v48, %s2391_s26 }
 0x1a5   : > { %v1240_v30 = vpop.permute.xlu0 %1239 }
 0x1a6   : > { %v1582_v1 = vpop.permute.xlu1 %1581  ;;  %v1281_v14 = vmul.f32 %v2848_v16, %v1240_v30 }
 0x1a7   : > { %v1628_v4 = vadd.f32 %v1582_v1, %v1452_v62 }
 0x1a9   : > { %2287 = vtanh.f32 %v1628_v4  ;;  %1757 = vrot.lane.b32.xlu1 %v1628_v4, %s2391_s26  ;;  %v1408_v19 = vpop.permute.xlu0 %1407 }
 0x1aa   : > { %v1242_v5 = vpop.permute.xlu1 %1241  ;;  %v1453_v59 = vadd.f32 %v1408_v19, %v1277_v11 }
 0x1ab   : > { %v1282_v4 = vmul.f32 %v2856_v21, %v1242_v5 }
 0x1ad   : > { %v1584_v32 = vpop.permute.xlu0 %1583 }
 0x1ae   : > { %v2286_v7 = vpop.eup %2285  ;;  %v1410_v0 = vpop.permute.xlu1 %1409  ;;  %v2938_v8 = vadd.f32 %v1584_v32, %v1453_v59 }
 0x1af   : > { %1675 = vrot.lane.b32.xlu0 %v2286_v7, %s2391_s26  ;;  %v1454_v26 = vadd.f32 %v1410_v0, %v1278_v63 }
 0x1b0   : > { %2289 = vtanh.f32 %v2938_v8 }
 0x1b1   : > { %v1244_v22 = vpop.permute.xlu0 %1243 }
 0x1b2   : > { %v1586_v34 = vpop.permute.xlu1 %1585  ;;  %v1283_v30 = vmul.f32 %v2869_v2, %v1244_v22 }
 0x1b3   : > { %v2288_v29 = vpop.eup %2287  ;;  %v2943_v46 = vadd.f32 %v1586_v34, %v1454_v26 }
 0x1b4   : > { %1677 = vrot.lane.b32.xlu1 %v2288_v29, %s2391_s26 }
 0x1b5   : > { %2291 = vtanh.f32 %v2943_v46  ;;  %v1412_v36 = vpop.permute.xlu0 %1411 }
 0x1b6   : > { %v1246_v40 = vpop.permute.xlu1 %1245  ;;  %v1455_v10 = vadd.f32 %v1412_v36, %v1279_v25 }
 0x1b7   : > { %v1284_v29 = vmul.f32 %v2877_v38, %v1246_v40 }
 0x1b9   : > { %v1588_v55 = vpop.permute.xlu0 %1587 }
 0x1ba   : > { %v2290_v44 = vpop.eup %2289  ;;  %v1414_v23 = vpop.permute.xlu1 %1413  ;;  %v2948_v47 = vadd.f32 %v1588_v55, %v1455_v10 }
 0x1bb   : > { %1679 = vrot.lane.b32.xlu0 %v2290_v44, %s2391_s26  ;;  %v1456_v50 = vadd.f32 %v1414_v23, %v1280_v45 }
 0x1bc   : > { %2293 = vtanh.f32 %v2948_v47 }
 0x1bd   : > { %v1248_v56 = vpop.permute.xlu0 %1247 }
 0x1be   : > { %v1590_v57 = vpop.permute.xlu1 %1589  ;;  %v1285_v22 = vmul.f32 %v2886_v53, %v1248_v56 }
 0x1bf   : > { %v2292_v42 = vpop.eup %2291  ;;  %v2953_v39 = vadd.f32 %v1590_v57, %v1456_v50 }
 0x1c0   : > { %1681 = vrot.lane.b32.xlu1 %v2292_v42, %s2391_s26 }
 0x1c1   : > { %2295 = vtanh.f32 %v2953_v39  ;;  %v1416_v51 = vpop.permute.xlu0 %1415 }
 0x1c2   : > { %v1250_v48 = vpop.permute.xlu1 %1249  ;;  %v1457_v61 = vadd.f32 %v1416_v51, %v1281_v14 }
 0x1c3   : > { %v1286_v42 = vmul.f32 %v2892_v60, %v1250_v48 }
 0x1c5   : > { %v1592_v28 = vpop.permute.xlu0 %1591 }
 0x1c6   : > { %v2294_v58 = vpop.eup %2293  ;;  %v1418_v62 = vpop.permute.xlu1 %1417  ;;  %v2958_v1 = vadd.f32 %v1592_v28, %v1457_v61 }
 0x1c7   : > { %1683 = vrot.lane.b32.xlu0 %v2294_v58, %s2391_s26  ;;  %v1458_v19 = vadd.f32 %v1418_v62, %v1282_v4 }
 0x1c8   : > { %2297 = vtanh.f32 %v2958_v1 }
 0x1c9   : > { %v1252_v11 = vpop.permute.xlu0 %1251 }
 0x1ca   : > { %v1594_v59 = vpop.permute.xlu1 %1593  ;;  %v1287_v61 = vmul.f32 %v2899_v12, %v1252_v11 }
 0x1cb   : > { %v2296_v32 = vpop.eup %2295  ;;  %v2963_v7 = vadd.f32 %v1594_v59, %v1458_v19 }
 0x1cc   : > { %1685 = vrot.lane.b32.xlu1 %v2296_v32, %s2391_s26 }
 0x1cd   : > { %2299 = vtanh.f32 %v2963_v7  ;;  %v1420_v16 = vpop.permute.xlu0 %1419 }
 0x1ce   : > { %v1254_v0 = vpop.permute.xlu1 %1253  ;;  %v1459_v63 = vadd.f32 %v1420_v16, %v1283_v30 }
 0x1cf   : > { %v1288_v59 = vmul.f32 %v2908_v24, %v1254_v0 }
 0x1d1   : > { %v1596_v21 = vpop.permute.xlu0 %1595 }
 0x1d2   : > { %v2298_v5 = vpop.eup %2297  ;;  %v1422_v26 = vpop.permute.xlu1 %1421  ;;  %v2968_v34 = vadd.f32 %v1596_v21, %v1459_v63 }
 0x1d3   : > { %1687 = vrot.lane.b32.xlu0 %v2298_v5, %s2391_s26  ;;  %v1460_v36 = vadd.f32 %v1422_v26, %v1284_v29 }
 0x1d4   : > { %2301 = vtanh.f32 %v2968_v34 }
 0x1d5   : > { %v1256_v25 = vpop.permute.xlu0 %1255 }
 0x1d6   : > { %v1598_v10 = vpop.permute.xlu1 %1597  ;;  %v1289_v16 = vmul.f32 %v2913_v6, %v1256_v25 }
 0x1d7   : > { %v2300_v55 = vpop.eup %2299  ;;  %v2973_v44 = vadd.f32 %v1598_v10, %v1460_v36 }
 0x1d8   : > { %1689 = vrot.lane.b32.xlu1 %v2300_v55, %s2391_s26 }
 0x1d9   : > { %2303 = vtanh.f32 %v2973_v44  ;;  %v1424_v2 = vpop.permute.xlu0 %1423 }
 0x1da   : > { %v1258_v23 = vpop.permute.xlu1 %1257  ;;  %v1461_v45 = vadd.f32 %v1424_v2, %v1285_v22  ;;  %v2060_v2 = vmul.f32 -1.442695, %v2706_v31  ;;  %v2064_v31 = vmul.f32 -1.442695, %v2722_v49 }
 0x1db   : > { %v1290_v29 = vmul.f32 %v2922_v35, %v1258_v23  ;;  %v2058_v35 = vmul.f32 -1.442695, %v2702_v27  ;;  %v2062_v27 = vmul.f32 -1.442695, %v2714_v43 }
 0x1dd   : > { %v1600_v38 = vpop.permute.xlu0 %1599 }
 0x1de   : > { %v2302_v40 = vpop.eup %2301  ;;  %v1426_v50 = vpop.permute.xlu1 %1425  ;;  %v1637_v57 = vadd.f32 %v1600_v38, %v1461_v45 }
 0x1df   : > { %1691 = vrot.lane.b32.xlu0 %v2302_v40, %s2391_s26  ;;  %v1462_v51 = vadd.f32 %v1426_v50, %v1286_v42 }
 0x1e0   : > { %2305 = vtanh.f32 %v1637_v57 }
 0x1e1   : > { %v1428_v14 = vpop.permute.xlu0 %1427 }
 0x1e2   : > { %v1602_v28 = vpop.permute.xlu1 %1601  ;;  %v1463_v4 = vadd.f32 %v1428_v14, %v1287_v61  ;;  %v2072_v14 = vmul.f32 -1.442695, %v2757_v41 }
 0x1e3   : > { %v2304_v58 = vpop.eup %2303  ;;  %v1638_v62 = vadd.f32 %v1602_v28, %v1462_v51 }
 0x1e4   : > { %1693 = vrot.lane.b32.xlu1 %v2304_v58, %s2391_s26 }
 0x1e5   : > { %2307 = vtanh.f32 %v1638_v62  ;;  %v1604_v53 = vpop.permute.xlu0 %1603 }
 0x1e6   : > { %v1430_v56 = vpop.permute.xlu1 %1429  ;;  %v1639_v19 = vadd.f32 %v1604_v53, %v1463_v4 }
 0x1e7   : > { %v1464_v60 = vadd.f32 %v1430_v56, %v1288_v59 }
 0x1e8   : > { %2309 = vtanh.f32 %v1639_v19 }
 0x1e9   : > { %v1432_v48 = vpop.permute.xlu0 %1431 }
 0x1ea   : > { %v2306_v32 = vpop.eup %2305  ;;  %v1606_v30 = vpop.permute.xlu1 %1605  ;;  %v1465_v11 = vadd.f32 %v1432_v48, %v1289_v16 }
 0x1eb   : > { %v1640_v12 = vadd.f32 %v1606_v30, %v1464_v60  ;;  %1695 = vrot.lane.b32.xlu0 %v2306_v32, %s2391_s26  ;;  %v2076_v60 = vmul.f32 -1.442695, %v2775_v20  ;;  %v2080_v20 = vmul.f32 -1.442695, %v2794_v54  ;;  %v2086_v54 = vmul.f32 -1.442695, %v2834_v33 }
 0x1ed   : > { %2311 = vtanh.f32 %v1640_v12  ;;  %v1608_v63 = vpop.permute.xlu0 %1607 }
 0x1ee   : > { %v1434_v21 = vpop.permute.xlu1 %1433  ;;  %v1641_v5 = vadd.f32 %v1608_v63, %v1465_v11  ;;  %v2078_v11 = vmul.f32 -1.442695, %v2789_v52 }
 0x1ef   : > { %v2308_v26 = vpop.eup %2307  ;;  %v1466_v24 = vadd.f32 %v1434_v21, %v1290_v29 }
 0x1f0   : > { %2313 = vtanh.f32 %v1641_v5  ;;  %1697 = vrot.lane.b32.xlu1 %v2308_v26, %s2391_s26 }
 0x1f2   : > { %v2310_v0 = vpop.eup %2309  ;;  %v1610_v36 = vpop.permute.xlu1 %1609 }
 0x1f3   : > { %v1642_v10 = vadd.f32 %v1610_v36, %v1466_v24  ;;  %1699 = vrot.lane.b32.xlu0 %v2310_v0, %s2391_s26  ;;  %v2082_v36 = vmul.f32 -1.442695, %v2810_v9 }
 0x1f5   : > { %2315 = vtanh.f32 %v1642_v10 }
 0x1f6   : > { %2317 = vpow2.f32 %v2058_v35 }
 0x1f7   : > { %v2312_v6 = vpop.eup %2311  ;;  %2319 = vpow2.f32 %v2060_v2 }
 0x1f8   : > { %1701 = vrot.lane.b32.xlu1 %v2312_v6, %s2391_s26  ;;  %2321 = vpow2.f32 %v2062_v27 }
 0x1f9   : > { %2323 = vpow2.f32 %v2064_v31 }
 0x1fa   : > { %v2314_v25 = vpop.eup %2313 }
 0x1fb   : > { %1703 = vrot.lane.b32.xlu0 %v2314_v25, %s2391_s26 }
 0x1ff   : > { %v2316_v55 = vpop.eup %2315  ;;  %1759 = vrot.lane.b32.xlu0 %v2938_v8, %s2391_s26 }
 0x200   : > { %1705 = vrot.lane.b32.xlu1 %v2316_v55, %s2391_s26  ;;  %v2318_v8 = vpop.eup %2317  ;;  %v2084_v55 = vmul.f32 -1.442695, %v2819_v15 }
 0x201   : > { %v2320_v43 = vpop.eup %2319 }
 0x202   : > { %v1118_v49 = vadd.f32 1.0, %v2320_v43  ;;  %v2088_v43 = vmul.f32 -1.442695, %v2842_v18 }
 0x203   : > { %1763 = vrot.lane.b32.xlu0 %v2948_v47, %s2391_s26 }
 0x204   : > { %1761 = vrot.lane.b32.xlu1 %v2943_v46, %s2391_s26  ;;  %v1116_v46 = vadd.f32 1.0, %v2318_v8 }
 0x206   : > { %2325 = vrcp.f32 %v1116_v46 }
 0x207   : > { %1767 = vrot.lane.b32.xlu0 %v2958_v1, %s2391_s26  ;;  %v2322_v1 = vpop.eup %2321  ;;  %2327 = vrcp.f32 %v1118_v49 }
 0x208   : > { %1765 = vrot.lane.b32.xlu1 %v2953_v39, %s2391_s26  ;;  %v2066_v39 = vmul.f32 -1.442695, %v2732_v13  ;;  %v2324_v22 = vpop.eup %2323  ;;  %v2070_v13 = vmul.f32 -1.442695, %v2749_v37  ;;  %v2074_v37 = vmul.f32 -1.442695, %v2770_v3 }
 0x209   : > { %v1122_v40 = vadd.f32 1.0, %v2324_v22 }
 0x20a   : > { %2329 = vpow2.f32 %v2066_v39 }
 0x20b   : > { %1771 = vrot.lane.b32.xlu0 %v2968_v34, %s2391_s26  ;;  %v1120_v34 = vadd.f32 1.0, %v2322_v1 }
 0x20c   : > { %1769 = vrot.lane.b32.xlu1 %v2963_v7, %s2391_s26 }
 0x20d   : > { %2331 = vrcp.f32 %v1120_v34 }
 0x20f   : > { %1775 = vrot.lane.b32.xlu0 %v1637_v57, %s2391_s26 }
 0x210   : > { %1773 = vrot.lane.b32.xlu1 %v2973_v44, %s2391_s26  ;;  %v2068_v44 = vmul.f32 -1.442695, %v2737_v17  ;;  %v2326_v23 = vpop.eup %2325 }
 0x211   : > { %v2328_v50 = vpop.eup %2327 }
 0x212   : > { %2333 = vpow2.f32 %v2068_v44 }
 0x213   : > { %1779 = vrot.lane.b32.xlu0 %v1639_v19, %s2391_s26  ;;  %2335 = vrcp.f32 %v1122_v40 }
 0x214   : > { %1777 = vrot.lane.b32.xlu1 %v1638_v62, %s2391_s26  ;;  %v2330_v42 = vpop.eup %2329  ;;  %2337 = vpow2.f32 %v2070_v13 }
 0x215   : > { %v1124_v17 = vadd.f32 1.0, %v2330_v42 }
 0x216   : > { %v1756_v47 = vpop.permute.xlu0 %1755 }
 0x217   : > { %1803 = vst.msk [vmem:[%s3017_s8] sm:$0xff] %vm447_vm0, %v1756_v47  ;;  %1783 = vrot.lane.b32.xlu0 %v1641_v5, %s2391_s26  ;;  %v2332_v61 = vpop.eup %2331  ;;  %2339 = vrcp.f32 %v1124_v17 }
 0x218   : > { %1781 = vrot.lane.b32.xlu1 %v1640_v12, %s2391_s26  ;;  %2341 = vpow2.f32 %v2072_v14 }
 0x21b   : > { %v1758_v7 = vpop.permute.xlu1 %1757 }
 0x21c   : > { %1804 = vst.msk [vmem:[%s3017_s8 + $0x8] sm:$0xff] %vm447_vm0, %v1758_v7  ;;  %1785 = vrot.lane.b32.xlu1 %v1642_v10, %s2391_s26  ;;  %v2334_v28 = vpop.eup %2333 }
 0x21d   : > { %v1126_v4 = vadd.f32 1.0, %v2334_v28  ;;  %v2336_v53 = vpop.eup %2335 }
 0x21e   : > { %v2338_v19 = vpop.eup %2337 }
 0x21f   : > { %2343 = vrcp.f32 %v1126_v4  ;;  %v1128_v41 = vadd.f32 1.0, %v2338_v19 }
 0x220   : > { %2345 = vpow2.f32 %v2074_v37 }
 0x221   : > { %v1676_v45 = vpop.permute.xlu0 %1675  ;;  %v2340_v48 = vpop.eup %2339  ;;  %2347 = vrcp.f32 %v1128_v41 }
 0x222   : > { %v1723_v38 = vmul.f32 %v2326_v23, %v1676_v45  ;;  %v2342_v32 = vpop.eup %2341  ;;  %2349 = vpow2.f32 %v2076_v60 }
 0x223   : > { %v1130_v12 = vadd.f32 1.0, %v2342_v32 }
 0x224   : > { %1835 = vrot.lane.b32.xlu0 %v1723_v38, %s2392_s28 }
 0x225   : > { %2351 = vrcp.f32 %v1130_v12 }
 0x226   : > { %v1678_v57 = vpop.permute.xlu1 %1677  ;;  %2353 = vpow2.f32 %v2078_v11 }
 0x227   : > { %v1724_v51 = vmul.f32 %v2328_v50, %v1678_v57 }
 0x229   : > { %1837 = vrot.lane.b32.xlu1 %v1724_v51, %s2392_s28  ;;  %v2344_v3 = vpop.eup %2343 }
 0x22a   : > { %v2346_v21 = vpop.eup %2345 }
 0x22b   : > { %v1132_v26 = vadd.f32 1.0, %v2346_v21  ;;  %v2348_v29 = vpop.eup %2347 }
 0x22c   : > { %v2350_v24 = vpop.eup %2349 }
 0x22d   : > { %v1680_v58 = vpop.permute.xlu0 %1679  ;;  %2355 = vrcp.f32 %v1132_v26  ;;  %v1134_v6 = vadd.f32 1.0, %v2350_v24 }
 0x22e   : > { %v1725_v62 = vmul.f32 %v2332_v61, %v1680_v58  ;;  %2357 = vpow2.f32 %v2080_v20 }
 0x22f   : > { %v2352_v52 = vpop.eup %2351  ;;  %2359 = vpow2.f32 %v2082_v36 }
 0x230   : > { %1839 = vrot.lane.b32.xlu0 %v1725_v62, %s2392_s28  ;;  %v2354_v2 = vpop.eup %2353  ;;  %2361 = vrcp.f32 %v1134_v6 }
 0x231   : > { %v1136_v27 = vadd.f32 1.0, %v2354_v2  ;;  %2363 = vpow2.f32 %v2084_v55 }
 0x232   : > { %v1682_v56 = vpop.permute.xlu1 %1681  ;;  %2365 = vpow2.f32 %v2086_v54 }
 0x233   : > { %v1726_v59 = vmul.f32 %v2336_v53, %v1682_v56  ;;  %2367 = vrcp.f32 %v1136_v27 }
 0x234   : > { %2369 = vpow2.f32 %v2088_v43 }
 0x235   : > { %1841 = vrot.lane.b32.xlu1 %v1726_v59, %s2392_s28 }
 0x237   : > { %v2356_v9 = vpop.eup %2355 }
 0x238   : > { %v2358_v8 = vpop.eup %2357 }
 0x239   : > { %v1684_v16 = vpop.permute.xlu0 %1683  ;;  %v2360_v47 = vpop.eup %2359  ;;  %v1138_v49 = vadd.f32 1.0, %v2358_v8 }
 0x23a   : > { %v1727_v30 = vmul.f32 %v2340_v48, %v1684_v16  ;;  %v2362_v15 = vpop.eup %2361  ;;  %v1140_v1 = vadd.f32 1.0, %v2360_v47 }
 0x23b   : > { %2371 = vrcp.f32 %v1138_v49  ;;  %v2364_v33 = vpop.eup %2363 }
 0x23c   : > { %1843 = vrot.lane.b32.xlu0 %v1727_v30, %s2392_s28  ;;  %2373 = vrcp.f32 %v1140_v1  ;;  %v2366_v34 = vpop.eup %2365  ;;  %v1142_v44 = vadd.f32 1.0, %v2364_v33 }
 0x23d   : > { %v2368_v22 = vpop.eup %2367  ;;  %v1144_v18 = vadd.f32 1.0, %v2366_v34 }
 0x23e   : > { %v1686_v63 = vpop.permute.xlu1 %1685  ;;  %2375 = vrcp.f32 %v1142_v44  ;;  %v2370_v38 = vpop.eup %2369 }
 0x23f   : > { %v1728_v5 = vmul.f32 %v2344_v3, %v1686_v63  ;;  %2377 = vrcp.f32 %v1144_v18  ;;  %v1146_v57 = vadd.f32 1.0, %v2370_v38 }
 0x241   : > { %1845 = vrot.lane.b32.xlu1 %v1728_v5, %s2392_s28  ;;  %2379 = vrcp.f32 %v1146_v57 }
 0x245   : > { %v1688_v0 = vpop.permute.xlu0 %1687  ;;  %v2372_v40 = vpop.eup %2371 }
 0x246   : > { %v1729_v10 = vmul.f32 %v2348_v29, %v1688_v0  ;;  %v2374_v42 = vpop.eup %2373 }
 0x248   : > { %1847 = vrot.lane.b32.xlu0 %v1729_v10, %s2392_s28  ;;  %v2376_v14 = vpop.eup %2375 }
 0x249   : > { %v2378_v58 = vpop.eup %2377 }
 0x24a   : > { %v1690_v25 = vpop.permute.xlu1 %1689 }
 0x24b   : > { %v1730_v35 = vmul.f32 %v2352_v52, %v1690_v25  ;;  %v2380_v53 = vpop.eup %2379 }
 0x24d   : > { %1849 = vrot.lane.b32.xlu1 %v1730_v35, %s2392_s28 }
 0x251   : > { %v1692_v31 = vpop.permute.xlu0 %1691 }
 0x252   : > { %v1731_v46 = vmul.f32 %v2356_v9, %v1692_v31 }
 0x254   : > { %1851 = vrot.lane.b32.xlu0 %v1731_v46, %s2392_s28 }
 0x256   : > { %v1694_v39 = vpop.permute.xlu1 %1693 }
 0x257   : > { %v1732_v7 = vmul.f32 %v2362_v15, %v1694_v39 }
 0x259   : > { %1853 = vrot.lane.b32.xlu1 %v1732_v7, %s2392_s28 }
 0x25d   : > { %v1696_v23 = vpop.permute.xlu0 %1695 }
 0x25e   : > { %v1733_v45 = vmul.f32 %v2368_v22, %v1696_v23 }
 0x260   : > { %1855 = vrot.lane.b32.xlu0 %v1733_v45, %s2392_s28 }
 0x262   : > { %v1698_v13 = vpop.permute.xlu1 %1697 }
 0x263   : > { %v1734_v50 = vmul.f32 %v2372_v40, %v1698_v13 }
 0x265   : > { %1857 = vrot.lane.b32.xlu1 %v1734_v50, %s2392_s28  ;;  %v1700_v51 = vpop.permute.xlu0 %1699 }
 0x266   : > { %v1735_v17 = vmul.f32 %v2374_v42, %v1700_v51 }
 0x268   : > { %1859 = vrot.lane.b32.xlu0 %v1735_v17, %s2392_s28 }
 0x26a   : > { %v1702_v61 = vpop.permute.xlu1 %1701 }
 0x26b   : > { %v1736_v28 = vmul.f32 %v2376_v14, %v1702_v61 }
 0x26d   : > { %1861 = vrot.lane.b32.xlu1 %v1736_v28, %s2392_s28  ;;  %v1704_v62 = vpop.permute.xlu0 %1703 }
 0x26e   : > { %v1737_v4 = vmul.f32 %v2378_v58, %v1704_v62 }
 0x270   : > { %1863 = vrot.lane.b32.xlu0 %v1737_v4, %s2392_s28 }
 0x271   : > { %v1760_v37 = vpop.permute.xlu0 %1759 }
 0x272   : > { %v1706_v56 = vpop.permute.xlu1 %1705  ;;  %1805 = vst.msk [vmem:[%s3017_s8 + $0x10] sm:$0xff] %vm447_vm0, %v1760_v37 }
 0x273   : > { %v1738_v19 = vmul.f32 %v2380_v53, %v1706_v56 }
 0x275   : > { %1865 = vrot.lane.b32.xlu1 %v1738_v19, %s2392_s28  ;;  %v1764_v59 = vpop.permute.xlu0 %1763 }
 0x276   : > { %v1762_v41 = vpop.permute.xlu1 %1761  ;;  %1807 = vst.msk [vmem:[%s3017_s8 + $0x20] sm:$0xff] %vm447_vm0, %v1764_v59 }
 0x277   : > { %1806 = vst.msk [vmem:[%s3017_s8 + $0x18] sm:$0xff] %vm447_vm0, %v1762_v41 }
 0x279   : > { %v1768_v60 = vpop.permute.xlu0 %1767 }
 0x27a   : > { %v1766_v48 = vpop.permute.xlu1 %1765  ;;  %1809 = vst.msk [vmem:[%s3017_s8 + $0x30] sm:$0xff] %vm447_vm0, %v1768_v60 }
 0x27b   : > { %1808 = vst.msk [vmem:[%s3017_s8 + $0x28] sm:$0xff] %vm447_vm0, %v1766_v48 }
 0x27d   : > { %v1772_v32 = vpop.permute.xlu0 %1771 }
 0x27e   : > { %v1770_v16 = vpop.permute.xlu1 %1769  ;;  %1811 = vst.msk [vmem:[%s3017_s8 + $0x40] sm:$0xff] %vm447_vm0, %v1772_v32 }
 0x27f   : > { %1810 = vst.msk [vmem:[%s3017_s8 + $0x38] sm:$0xff] %vm447_vm0, %v1770_v16 }
 0x281   : > { %v1776_v30 = vpop.permute.xlu0 %1775 }
 0x282   : > { %v1774_v12 = vpop.permute.xlu1 %1773  ;;  %1813 = vst.msk [vmem:[%s3017_s8 + $0x50] sm:$0xff] %vm447_vm0, %v1776_v30 }
 0x283   : > { %1812 = vst.msk [vmem:[%s3017_s8 + $0x48] sm:$0xff] %vm447_vm0, %v1774_v12 }
 0x285   : > { %v1780_v3 = vpop.permute.xlu0 %1779 }
 0x286   : > { %v1778_v11 = vpop.permute.xlu1 %1777  ;;  %1815 = vst.msk [vmem:[%s3017_s8 + $0x60] sm:$0xff] %vm447_vm0, %v1780_v3 }
 0x287   : > { %1814 = vst.msk [vmem:[%s3017_s8 + $0x58] sm:$0xff] %vm447_vm0, %v1778_v11 }
 0x289   : > { %v1784_v63 = vpop.permute.xlu0 %1783 }
 0x28a   : > { %v1782_v21 = vpop.permute.xlu1 %1781  ;;  %1817 = vst.msk [vmem:[%s3017_s8 + $0x70] sm:$0xff] %vm447_vm0, %v1784_v63 }
 0x28b   : > { %1816 = vst.msk [vmem:[%s3017_s8 + $0x68] sm:$0xff] %vm447_vm0, %v1782_v21 }
 0x28e   : > { %v1786_v5 = vpop.permute.xlu1 %1785 }
 0x28f   : > { %1818 = vst.msk [vmem:[%s3017_s8 + $0x78] sm:$0xff] %vm447_vm0, %v1786_v5 }
 0x296   : > { %v1836_v26 = vpop.permute.xlu0 %1835 }
 0x297   : > { %1884 = vst.msk [vmem:[%s3017_s8] sm:$0xff] %vm1883_vm1, %v1836_v26 }
 0x29b   : > { %v1838_v20 = vpop.permute.xlu1 %1837 }
 0x29c   : > { %1885 = vst.msk [vmem:[%s3017_s8 + $0x8] sm:$0xff] %vm1883_vm1, %v1838_v20 }
 0x2a2   : > { %v1840_v29 = vpop.permute.xlu0 %1839 }
 0x2a3   : > { %1886 = vst.msk [vmem:[%s3017_s8 + $0x10] sm:$0xff] %vm1883_vm1, %v1840_v29 }
 0x2a7   : > { %v1842_v24 = vpop.permute.xlu1 %1841 }
 0x2a8   : > { %1887 = vst.msk [vmem:[%s3017_s8 + $0x18] sm:$0xff] %vm1883_vm1, %v1842_v24 }
 0x2ae   : > { %v1844_v0 = vpop.permute.xlu0 %1843 }
 0x2af   : > { %1888 = vst.msk [vmem:[%s3017_s8 + $0x20] sm:$0xff] %vm1883_vm1, %v1844_v0 }
 0x2b3   : > { %v1846_v36 = vpop.permute.xlu1 %1845 }
 0x2b4   : > { %1889 = vst.msk [vmem:[%s3017_s8 + $0x28] sm:$0xff] %vm1883_vm1, %v1846_v36 }
 0x2ba   : > { %v1848_v10 = vpop.permute.xlu0 %1847 }
 0x2bb   : > { %1890 = vst.msk [vmem:[%s3017_s8 + $0x30] sm:$0xff] %vm1883_vm1, %v1848_v10 }
 0x2bf   : > { %v1850_v6 = vpop.permute.xlu1 %1849 }
 0x2c0   : > { %1891 = vst.msk [vmem:[%s3017_s8 + $0x38] sm:$0xff] %vm1883_vm1, %v1850_v6 }
 0x2c6   : > { %v1852_v52 = vpop.permute.xlu0 %1851 }
 0x2c7   : > { %1892 = vst.msk [vmem:[%s3017_s8 + $0x40] sm:$0xff] %vm1883_vm1, %v1852_v52 }
 0x2cb   : > { %v1854_v25 = vpop.permute.xlu1 %1853 }
 0x2cc   : > { %1893 = vst.msk [vmem:[%s3017_s8 + $0x48] sm:$0xff] %vm1883_vm1, %v1854_v25 }
 0x2d2   : > { %v1856_v55 = vpop.permute.xlu0 %1855 }
 0x2d3   : > { %1894 = vst.msk [vmem:[%s3017_s8 + $0x50] sm:$0xff] %vm1883_vm1, %v1856_v55 }
 0x2d7   : > { %v1858_v35 = vpop.permute.xlu1 %1857 }
 0x2d8   : > { %1895 = vst.msk [vmem:[%s3017_s8 + $0x58] sm:$0xff] %vm1883_vm1, %v1858_v35 }
 0x2da   : > { %v1860_v2 = vpop.permute.xlu0 %1859 }
 0x2db   : > { %1896 = vst.msk [vmem:[%s3017_s8 + $0x60] sm:$0xff] %vm1883_vm1, %v1860_v2 }
 0x2df   : > { %v1862_v54 = vpop.permute.xlu1 %1861 }
 0x2e0   : > { %1897 = vst.msk [vmem:[%s3017_s8 + $0x68] sm:$0xff] %vm1883_vm1, %v1862_v54 }
 0x2e2   : > { %v1864_v27 = vpop.permute.xlu0 %1863 }
 0x2e3   : > { %1898 = vst.msk [vmem:[%s3017_s8 + $0x70] sm:$0xff] %vm1883_vm1, %v1864_v27 }
 0x2e7   : > { %v1866_v9 = vpop.permute.xlu1 %1865 }
 0x2e8   : > { %1899 = vst.msk [vmem:[%s3017_s8 + $0x78] sm:$0xff] %vm1883_vm1, %v1866_v9 }
 0x2e9 PF: > { %s17_s24 = sadd.s32 1, %s2387_s24  }
 0x2ea   : > { %p14_p4 = scmp.ge.s32.totalorder %s17_s24, 4  }
 0x2ec   :  { %16 = sbr.rel (!%p14_p4) target bundleno = 1 (0x1), region = 90 }

</bundles_post_ra>
